<compile_context>
chip_gen: v7x
topology: tpu7x:2x2x1
jax: 0.10.0
libtpu: 0.0.40
codegen_flags: <defaults>
</compile_context>

<pallas_src>
import functools

import jax
import jax.numpy as jnp
from jax.experimental import pallas as pl
from jax.experimental.pallas import tpu as pltpu


def _sigmoid(x):
    return 1.0 / (1.0 + jnp.exp(-x))


def _softplus(x):
    # numerically stable softplus: max(x, 0) + log(1 + exp(-|x|))
    return jnp.maximum(x, 0.0) + jnp.log(1.0 + jnp.exp(-jnp.abs(x)))


# -----------------------------------------------------------------------------
# Kernel
# -----------------------------------------------------------------------------
def _dual_tower_kernel(x_ref, w1_ref, w2_ref, aux_ref, out_ref, *, hidden_dim):
    """One batch tile of the fused dual-tower forward.

    x_ref   : (TB, E+1)     [user_embed | treatment_L] in the matmul dtype
    w1_ref  : (E+1, 3H)     [w1z | w1d | w1o(E+1 rows, t-row folded in)]
    w2_ref  : (3H, N2)      block-diagonal second-layer pack (N2 = 128-padded):
                              cols [0:H]     <- rows [2H:3H] (outcome w2)
                              col  [H]       <- rows [0:H]   (zero    w2)
                              cols [H+1:H+3] <- rows [H:2H]  (density w2)
    aux_ref : (8, AW) f32   row0: b1 pack (3H)
                            row1: b2 pack (H+3, zero-padded to N2)
                            row2: outcome head weight w3 (H)
                            row3: outcome head bias b3 (lane 0)
    out_ref : (TB, 4)       columns = p_zero, mu, sigma, outcome
    """
    H = hidden_dim
    f32 = jnp.float32
    cdt = w1_ref.dtype                       # matmul operand dtype (f32 / bf16)
    n2 = w2_ref.shape[1]

    x = x_ref[...]                           # already in cdt (wrapper-cast)

    b1 = aux_ref[0:1, 0:3 * H]               # (1, 3H)  f32
    b2 = aux_ref[1:2, 0:n2]                  # (1, N2)  f32
    w3o = aux_ref[2:3, 0:H]                  # (1, H)   f32
    b3o = aux_ref[3:4, 0:1]                  # (1, 1)   f32

    # ---- layer 1: all three towers (incl. the cat([x, t]) column) in one matmul
    h = jnp.dot(x, w1_ref[...], preferred_element_type=f32)       # (TB, 3H) f32
    h = jnp.maximum(h + b1, 0.0)

    # ---- layer 2: block-diagonal fused matmul ---------------------------------
    y = jnp.dot(h.astype(cdt), w2_ref[...], preferred_element_type=f32) + b2

    h2 = jnp.maximum(y[:, 0:H], 0.0)          # outcome-tower hidden (TB, H)
    p_zero = _sigmoid(y[:, H:H + 1])          # zero-classifier
    mu = y[:, H + 1:H + 2]                    # density mu
    sigma = _softplus(y[:, H + 2:H + 3]) + 1e-6

    # N=1 outcome head: VPU multiply + XLU lane reduce (keep it off the MXU).
    logit_o = jnp.sum(h2 * w3o, axis=-1, keepdims=True) + b3o
    outcome = _sigmoid(logit_o)

    # Padded tail rows (Bp > B) are zero-filled inputs: they produce finite
    # garbage that the wrapper slices off; nothing reduces over the batch axis.
    out_ref[...] = jnp.concatenate([p_zero, mu, sigma, outcome], axis=1)


# -----------------------------------------------------------------------------
# Parameter init / packing
# -----------------------------------------------------------------------------
def init_params(key, embed_dim, hidden_dim=64):
    """Deterministic synthetic parameter init (matches the nn.Module shapes)."""
    ks = jax.random.split(key, 10)

    def lin(k, fan_in, fan_out):
        bound = 1.0 / (fan_in ** 0.5)
        kw, kb = jax.random.split(k)
        w = jax.random.uniform(kw, (fan_in, fan_out), jnp.float32, -bound, bound)
        b = jax.random.uniform(kb, (1, fan_out), jnp.float32, -bound, bound)
        return w, b

    p = {}
    # zero_classifier: Linear(E,H) -> ReLU -> Linear(H,1) -> Sigmoid
    p["w1z"], p["b1z"] = lin(ks[0], embed_dim, hidden_dim)
    p["w2z"], p["b2z"] = lin(ks[1], hidden_dim, 1)
    # density_estimator: Linear(E,H) -> ReLU -> Linear(H,2)
    p["w1d"], p["b1d"] = lin(ks[2], embed_dim, hidden_dim)
    p["w2d"], p["b2d"] = lin(ks[3], hidden_dim, 2)
    # outcome_predictor: Linear(E+1,H) -> ReLU -> Dropout -> Linear(H,H) -> ReLU
    #                    -> Linear(H,1) -> Sigmoid
    w1o, p["b1o"] = lin(ks[4], embed_dim + 1, hidden_dim)
    p["w1ox"] = w1o[:embed_dim, :]            # (E, H) applied to user_embed
    p["w1ot"] = w1o[embed_dim:, :]            # (1, H) applied to treatment_L
    p["w2o"], p["b2o"] = lin(ks[5], hidden_dim, hidden_dim)
    p["w3o"], p["b3o"] = lin(ks[6], hidden_dim, 1)
    return p


def pack_params(params, embed_dim, hidden_dim, weight_dtype=jnp.float32):
    """Pack the per-layer tensors into 3 kernel arrays (W1, W2, AUX).

    W1/W2 (matmul operands) are stored in `weight_dtype` (bf16 on v6e/v7x is
    fine); AUX (biases + tiny head vectors, VPU-consumed) stays f32.
    """
    E, H = embed_dim, hidden_dim
    f32 = jnp.float32
    n2 = max(128, pl.cdiv(H + 3, 128) * 128)      # lane-padded layer-2 N dim
    aw = max(3 * H, n2)

    # W1: (E+1, 3H); the treatment column of the outcome tower is row E.
    w1 = jnp.zeros((E + 1, 3 * H), f32)
    w1 = w1.at[:E, 0:H].set(params["w1z"])
    w1 = w1.at[:E, H:2 * H].set(params["w1d"])
    w1 = w1.at[:E, 2 * H:3 * H].set(params["w1ox"])
    w1 = w1.at[E, 2 * H:3 * H].set(params["w1ot"][0])

    # W2: block-diagonal pack, lane-padded to n2 columns.
    w2 = jnp.zeros((3 * H, n2), f32)
    w2 = w2.at[2 * H:3 * H, 0:H].set(params["w2o"])
    w2 = w2.at[0:H, H].set(params["w2z"][:, 0])
    w2 = w2.at[H:2 * H, H + 1:H + 3].set(params["w2d"])

    aux = jnp.zeros((8, aw), f32)
    aux = aux.at[0, 0:3 * H].set(
        jnp.concatenate([params["b1z"], params["b1d"], params["b1o"]], axis=1)[0])
    b2_all = jnp.concatenate(
        [params["b2o"][0], params["b2z"][0], params["b2d"][0]], axis=0)   # (H+3,)
    aux = aux.at[1, 0:H + 3].set(b2_all)
    aux = aux.at[2, 0:H].set(params["w3o"][:, 0])
    aux = aux.at[3, 0].set(params["b3o"][0, 0])

    return (w1.astype(weight_dtype), w2.astype(weight_dtype), aux)


# -----------------------------------------------------------------------------
# Wrapper
# -----------------------------------------------------------------------------
def _choose_block_b(batch, requested):
    """Lane-aligned batch tile; keep >=2 grid steps when the batch allows it
    so the 'parallel' grid axis can shard across v7x's 2 TensorCores."""
    b128 = pl.cdiv(batch, 128) * 128
    blk = max(128, (min(requested, b128) // 128) * 128)
    if b128 >= 256 and blk > b128 // 2:
        blk = max(128, ((b128 // 2) // 128) * 128)
    return blk


def dual_tower_forward(user_embed, treatment_L, packed, *, hidden_dim=64,
                       block_b=1024):
    """Fused forward. Returns dict like the PyTorch module (eval mode)."""
    w1, w2, aux = packed
    B, E = user_embed.shape
    H = hidden_dim
    assert w1.shape == (E + 1, 3 * H)
    n2 = w2.shape[1]
    cdt = w1.dtype

    blk = _choose_block_b(B, block_b)
    n_blk = pl.cdiv(B, blk)
    Bp = n_blk * blk

    # Fold treatment into the last column of x; cast to the matmul dtype in the
    # wrapper (halves the dominant HBM stream when weights are bf16).
    t = treatment_L.reshape(B, 1).astype(jnp.float32)
    x = jnp.concatenate([user_embed.astype(jnp.float32), t], axis=1).astype(cdt)
    if Bp != B:
        x = jnp.pad(x, ((0, Bp - B), (0, 0)))

    kernel = functools.partial(_dual_tower_kernel, hidden_dim=H)

    flops = 2 * Bp * ((E + 1) * 3 * H + 3 * H * n2 + H)
    bytes_accessed = (x.size * x.dtype.itemsize
                      + w1.size * w1.dtype.itemsize
                      + w2.size * w2.dtype.itemsize
                      + aux.size * aux.dtype.itemsize
                      + Bp * 4 * 4)

    out = pl.pallas_call(
        kernel,
        out_shape=jax.ShapeDtypeStruct((Bp, 4), jnp.float32),
        grid=(n_blk,),
        in_specs=[
            pl.BlockSpec((blk, E + 1), lambda i: (i, 0)),       # x tile
            pl.BlockSpec((E + 1, 3 * H), lambda i: (0, 0)),     # W1 pack (resident)
            pl.BlockSpec((3 * H, n2), lambda i: (0, 0)),        # W2 pack (resident)
            pl.BlockSpec(aux.shape, lambda i: (0, 0)),          # AUX pack (resident)
        ],
        out_specs=pl.BlockSpec((blk, 4), lambda i: (i, 0)),
        compiler_params=pltpu.CompilerParams(
            dimension_semantics=("parallel",)),
        cost_estimate=pl.CostEstimate(
            flops=flops, transcendentals=6 * Bp, bytes_accessed=bytes_accessed),
    )(x, w1, w2, aux)

    p_zero = out[:B, 0:1]
    mu = out[:B, 1]
    sigma = out[:B, 2]
    outcome = out[:B, 3:4]
    return {"p_zero": p_zero, "mu": mu, "sigma": sigma, "outcome": outcome}


# -----------------------------------------------------------------------------
# Pure-JAX reference (mirrors the PyTorch forward in eval mode).
# `compute_dtype` mirrors the kernel's matmul quantization: inputs, layer-1
# activations and matmul weights are rounded; biases / the N=1 head stay f32.
# -----------------------------------------------------------------------------
def _reference_forward(user_embed, treatment_L, params,
                       compute_dtype=jnp.float32):
    f32 = jnp.float32

    def dot(a, b):
        return jnp.dot(a.astype(compute_dtype), b.astype(compute_dtype),
                       preferred_element_type=f32)

    x = user_embed.astype(f32)
    t = treatment_L.reshape(-1, 1).astype(f32)

    hz = jax.nn.relu(dot(x, params["w1z"]) + params["b1z"])
    p_zero = jax.nn.sigmoid(dot(hz, params["w2z"]) + params["b2z"])

    hd = jax.nn.relu(dot(x, params["w1d"]) + params["b1d"])
    dp = dot(hd, params["w2d"]) + params["b2d"]
    mu = dp[:, 0]
    sigma = jax.nn.softplus(dp[:, 1]) + 1e-6

    ho = jax.nn.relu(dot(x, params["w1ox"]) + dot(t, params["w1ot"])
                     + params["b1o"])
    h2 = jax.nn.relu(dot(ho, params["w2o"]) + params["b2o"])
    outcome = jax.nn.sigmoid(h2 @ params["w3o"] + params["b3o"])
    return {"p_zero": p_zero, "mu": mu, "sigma": sigma, "outcome": outcome}


# -----------------------------------------------------------------------------
# Demo / self-check
# -----------------------------------------------------------------------------
if __name__ == "__main__":
    B, E, H = 200, 32, 64        # B=200 -> padded to 256 -> 2 grid tiles of 128

    key = jax.random.PRNGKey(0)
    k_x, k_t = jax.random.split(key)
    user_embed = jax.random.normal(k_x, (B, E), jnp.float32)
    treatment_L = jax.random.uniform(k_t, (B,), jnp.float32, 0.0, 10.0)

    params = init_params(jax.random.PRNGKey(42), E, H)

    # ---- f32 weights: strict check vs the pure-JAX reference -------------------
    packed_f32 = pack_params(params, E, H, jnp.float32)
    out = dual_tower_forward(user_embed, treatment_L, packed_f32, hidden_dim=H)
    out = jax.tree_util.tree_map(jax.block_until_ready, out)

    ref = _reference_forward(user_embed, treatment_L, params)
    for name in ("p_zero", "mu", "sigma", "outcome"):
        assert out[name].shape == ref[name].shape, name
        assert jnp.allclose(out[name], ref[name], atol=1e-5, rtol=1e-5), name

    # ---- bf16 matmul path (v6e/v7x MXU): check vs bf16-mirroring reference -----
    packed_bf16 = pack_params(params, E, H, jnp.bfloat16)
    out_bf = dual_tower_forward(user_embed, treatment_L, packed_bf16,
                                hidden_dim=H)
    out_bf = jax.tree_util.tree_map(jax.block_until_ready, out_bf)

    ref_bf = _reference_forward(user_embed, treatment_L, params,
                                compute_dtype=jnp.bfloat16)
    for name in ("p_zero", "mu", "sigma", "outcome"):
        assert out_bf[name].shape == ref_bf[name].shape, name
        assert jnp.allclose(out_bf[name], ref_bf[name], atol=2e-2, rtol=2e-2), name

    print("KERNEL_OK")
</pallas_src>

<mosaic_0001>
module attributes {stable_mosaic.version = 11 : i64} {
  func.func @_dual_tower_kernel(%arg0: i32, %arg1: memref<128x33xf32, #tpu.memory_space<vmem>>, %arg2: memref<33x192xf32, #tpu.memory_space<vmem>>, %arg3: memref<192x128xf32, #tpu.memory_space<vmem>>, %arg4: memref<8x192xf32, #tpu.memory_space<vmem>>, %arg5: memref<128x4xf32, #tpu.memory_space<vmem>>) attributes {dimension_semantics = [#tpu.dimension_semantics<parallel>], iteration_bounds = array<i64: 2>, scalar_prefetch = 0 : i64, scratch_operands = 0 : i64, tpu.core_type = #tpu.core_type<tc>, window_params = [{transform_indices = @transform_0, window_bounds = array<i64: 128, 33>}, {pipeline_mode = #tpu.pipeline_mode<synchronous>, transform_indices = @transform_1, window_bounds = array<i64: 33, 192>}, {pipeline_mode = #tpu.pipeline_mode<synchronous>, transform_indices = @transform_2, window_bounds = array<i64: 192, 128>}, {pipeline_mode = #tpu.pipeline_mode<synchronous>, transform_indices = @transform_3, window_bounds = array<i64: 8, 192>}, {transform_indices = @transform_4, window_bounds = array<i64: 128, 4>}]} {
    %c0 = arith.constant 0 : index
    %c0_0 = arith.constant 0 : index
    %0 = vector.load %arg1[%c0, %c0_0] : memref<128x33xf32, #tpu.memory_space<vmem>>, vector<128x33xf32>
    %c0_1 = arith.constant 0 : index
    %c0_2 = arith.constant 0 : index
    %1 = vector.load %arg4[%c0_1, %c0_2] : memref<8x192xf32, #tpu.memory_space<vmem>>, vector<1x192xf32>
    %c1 = arith.constant 1 : index
    %c0_3 = arith.constant 0 : index
    %2 = vector.load %arg4[%c1, %c0_3] : memref<8x192xf32, #tpu.memory_space<vmem>>, vector<1x128xf32>
    %c2 = arith.constant 2 : index
    %c0_4 = arith.constant 0 : index
    %3 = vector.load %arg4[%c2, %c0_4] : memref<8x192xf32, #tpu.memory_space<vmem>>, vector<1x64xf32>
    %c3 = arith.constant 3 : index
    %c0_5 = arith.constant 0 : index
    %4 = vector.load %arg4[%c3, %c0_5] : memref<8x192xf32, #tpu.memory_space<vmem>>, vector<1x1xf32>
    %c0_6 = arith.constant 0 : index
    %c0_7 = arith.constant 0 : index
    %5 = vector.load %arg2[%c0_6, %c0_7] : memref<33x192xf32, #tpu.memory_space<vmem>>, vector<33x192xf32>
    %cst = arith.constant dense<0.000000e+00> : vector<128x192xf32>
    %6 = tpu.matmul %0, %5, %cst {dimension_numbers = #tpu.dot_dimension_numbers<[1], [0], [0], [1], [0, 0, 1, 1], [], []>} : vector<128x33xf32>, vector<33x192xf32>, vector<128x192xf32> -> vector<128x192xf32>
    %7 = vector.broadcast %1 : vector<1x192xf32> to vector<128x192xf32>
    %8 = arith.addf %6, %7 : vector<128x192xf32>
    %cst_8 = arith.constant 0.000000e+00 : f32
    %9 = vector.broadcast %cst_8 : f32 to vector<128x192xf32>
    %10 = arith.maximumf %8, %9 : vector<128x192xf32>
    %c0_9 = arith.constant 0 : index
    %c0_10 = arith.constant 0 : index
    %11 = vector.load %arg3[%c0_9, %c0_10] : memref<192x128xf32, #tpu.memory_space<vmem>>, vector<192x128xf32>
    %cst_11 = arith.constant dense<0.000000e+00> : vector<128x128xf32>
    %12 = tpu.matmul %10, %11, %cst_11 {dimension_numbers = #tpu.dot_dimension_numbers<[1], [0], [0], [1], [0, 0, 1, 1], [], []>} : vector<128x192xf32>, vector<192x128xf32>, vector<128x128xf32> -> vector<128x128xf32>
    %13 = vector.broadcast %2 : vector<1x128xf32> to vector<128x128xf32>
    %14 = arith.addf %12, %13 : vector<128x128xf32>
    %15 = vector.extract_strided_slice %14 {offsets = [0, 0], sizes = [128, 64], strides = [1, 1]} : vector<128x128xf32> to vector<128x64xf32>
    %cst_12 = arith.constant 0.000000e+00 : f32
    %16 = vector.broadcast %cst_12 : f32 to vector<128x64xf32>
    %17 = arith.maximumf %15, %16 : vector<128x64xf32>
    %18 = vector.extract_strided_slice %14 {offsets = [0, 64], sizes = [128, 1], strides = [1, 1]} : vector<128x128xf32> to vector<128x1xf32>
    %cst_13 = arith.constant 0.000000e+00 : f32
    %19 = vector.broadcast %cst_13 : f32 to vector<128x1xf32>
    %20 = arith.subf %19, %18 : vector<128x1xf32>
    %21 = math.exp %20 : vector<128x1xf32>
    %cst_14 = arith.constant 1.000000e+00 : f32
    %22 = vector.broadcast %cst_14 : f32 to vector<128x1xf32>
    %23 = arith.addf %22, %21 : vector<128x1xf32>
    %cst_15 = arith.constant 1.000000e+00 : f32
    %24 = vector.broadcast %cst_15 : f32 to vector<128x1xf32>
    %25 = arith.divf %24, %23 : vector<128x1xf32>
    %26 = vector.extract_strided_slice %14 {offsets = [0, 65], sizes = [128, 1], strides = [1, 1]} : vector<128x128xf32> to vector<128x1xf32>
    %27 = vector.extract_strided_slice %14 {offsets = [0, 66], sizes = [128, 1], strides = [1, 1]} : vector<128x128xf32> to vector<128x1xf32>
    %cst_16 = arith.constant 0.000000e+00 : f32
    %28 = vector.broadcast %cst_16 : f32 to vector<128x1xf32>
    %29 = arith.maximumf %27, %28 : vector<128x1xf32>
    %30 = math.absf %27 : vector<128x1xf32>
    %cst_17 = arith.constant 0.000000e+00 : f32
    %31 = vector.broadcast %cst_17 : f32 to vector<128x1xf32>
    %32 = arith.subf %31, %30 : vector<128x1xf32>
    %33 = math.exp %32 : vector<128x1xf32>
    %cst_18 = arith.constant 1.000000e+00 : f32
    %34 = vector.broadcast %cst_18 : f32 to vector<128x1xf32>
    %35 = arith.addf %34, %33 : vector<128x1xf32>
    %36 = math.log %35 : vector<128x1xf32>
    %37 = arith.addf %29, %36 : vector<128x1xf32>
    %cst_19 = arith.constant 9.99999997E-7 : f32
    %38 = vector.broadcast %cst_19 : f32 to vector<128x1xf32>
    %39 = arith.addf %37, %38 : vector<128x1xf32>
    %40 = vector.broadcast %3 : vector<1x64xf32> to vector<128x64xf32>
    %41 = arith.mulf %17, %40 : vector<128x64xf32>
    %cst_20 = arith.constant dense<0.000000e+00> : vector<128xf32>
    %42 = vector.multi_reduction <add>, %41, %cst_20 [1] : vector<128x64xf32> to vector<128xf32>
    %43 = vector.shape_cast %42 : vector<128xf32> to vector<128x1xf32>
    %44 = vector.broadcast %4 : vector<1x1xf32> to vector<128x1xf32>
    %45 = arith.addf %43, %44 : vector<128x1xf32>
    %cst_21 = arith.constant 0.000000e+00 : f32
    %46 = vector.broadcast %cst_21 : f32 to vector<128x1xf32>
    %47 = arith.subf %46, %45 : vector<128x1xf32>
    %48 = math.exp %47 : vector<128x1xf32>
    %cst_22 = arith.constant 1.000000e+00 : f32
    %49 = vector.broadcast %cst_22 : f32 to vector<128x1xf32>
    %50 = arith.addf %49, %48 : vector<128x1xf32>
    %cst_23 = arith.constant 1.000000e+00 : f32
    %51 = vector.broadcast %cst_23 : f32 to vector<128x1xf32>
    %52 = arith.divf %51, %50 : vector<128x1xf32>
    %53 = tpu.concatenate %25, %26, %39, %52 in 1 : vector<128x1xf32>, vector<128x1xf32>, vector<128x1xf32>, vector<128x1xf32> -> vector<128x4xf32>
    %c0_24 = arith.constant 0 : index
    %c0_25 = arith.constant 0 : index
    %54 = vector.load %arg5[%c0_24, %c0_25] : memref<128x4xf32, #tpu.memory_space<vmem>>, vector<128x4xf32>
    tpu.vector_store %arg5[%c0_24, %c0_25], %53 {strides = array<i32>} : memref<128x4xf32, #tpu.memory_space<vmem>>, vector<128x4xf32>,
    return
  }
  func.func @transform_0(%arg0: i32) -> (i32, i32) {
    %c0_i32 = arith.constant 0 : i32
    %c0_i32_0 = arith.constant 0 : i32
    return %arg0, %c0_i32 : i32, i32
  }
  func.func @transform_1(%arg0: i32) -> (i32, i32) {
    %c0_i32 = arith.constant 0 : i32
    %c0_i32_0 = arith.constant 0 : i32
    %c0_i32_1 = arith.constant 0 : i32
    return %c0_i32, %c0_i32_0 : i32, i32
  }
  func.func @transform_2(%arg0: i32) -> (i32, i32) {
    %c0_i32 = arith.constant 0 : i32
    %c0_i32_0 = arith.constant 0 : i32
    %c0_i32_1 = arith.constant 0 : i32
    return %c0_i32, %c0_i32_0 : i32, i32
  }
  func.func @transform_3(%arg0: i32) -> (i32, i32) {
    %c0_i32 = arith.constant 0 : i32
    %c0_i32_0 = arith.constant 0 : i32
    %c0_i32_1 = arith.constant 0 : i32
    return %c0_i32, %c0_i32_0 : i32, i32
  }
  func.func @transform_4(%arg0: i32) -> (i32, i32) {
    %c0_i32 = arith.constant 0 : i32
    %c0_i32_0 = arith.constant 0 : i32
    return %arg0, %c0_i32 : i32, i32
  }
}

</mosaic_0001>

<bundles_post_ra>
// kernel: tpu_custom_call.1
= control target key start
LH: loop header
LB: loop body
LE: loop exit
PB: predicated region body
PF: predicated region fallthrough
CT: control target
= control target key end

     0   :  { %s1875_s15 = smov 0   ;;  %s2636_s0 = inlined_call_operand.vmem [shape: f32[256,33], index: 0, kind: input, shape index: {}]   ;;  %s2637_s1 = inlined_call_operand.vmem [shape: f32[33,192], index: 1, kind: input, shape index: {}]   ;;  %s2638_s2 = inlined_call_operand.vmem [shape: f32[192,128], index: 2, kind: input, shape index: {}]   ;;  %s2639_s3 = inlined_call_operand.vmem [shape: f32[8,192], index: 3, kind: input, shape index: {}]   ;;  %s2640_s4 = inlined_call_operand.vmem [shape: f32[256,4], index: 4, kind: output, shape index: {}]  }
   0x1 LB: > { %s1521_s16 = sadd.s32 4294967295, %s1844_s15   ;;  %p1525_p0 = scmp.ge.s32.totalorder %s1844_s15, 1  ;;  %s1844_s15 = sphi %s1875_s15, %s14_s15  }
   0x2   : > { %p163_p1 = scmp.lt.s32.totalorder %s1844_s15, 3 }
   0x4   : > { %p164_p2 = pnand %p1525_p0, %p163_p1 }
   0x5   : > { %v222_v0 = vld [vmem:[%s2637_s1 + $0x8] sm:$0xff] (!%p164_p2)  ;;  %v224_v1 = vld [vmem:[%s2637_s1 + $0x18] sm:$0xff] (!%p164_p2)  ;;  %v221_v2 = vld [vmem:[%s2637_s1] sm:$0xff] (!%p164_p2)  ;;  %s1526_s23 = sshll.u32 (!%p164_p2), %s1521_s16, 4  ;;  %v1846_v7 = vmov (!%p164_p2), 0.0   ;;  %v1847_v12 = vmov (!%p164_p2), 0.0|0.0  }
   0x6   : > { %167 = sbr.rel (%p164_p2) target bundleno = 1157 (0x485), region = 36  ;;  %v1566_v3 = vpack.c.bf16 (!%p164_p2), %v224_v1, %v222_v0  ;;  %v223_v4 = vld [vmem:[%s2637_s1 + $0x10] sm:$0xff] (!%p164_p2)  ;;  %v226_v5 = vld [vmem:[%s2637_s1 + $0x28] sm:$0xff] (!%p164_p2)  ;;  %v228_v6 = vld [vmem:[%s2637_s1 + $0x38] sm:$0xff] (!%p164_p2)  ;;  %362 = vmatprep.mubr.f32.mxu0 (!%p164_p2), %v1846_v7  ;;  %p190_p3 = scmp.lt.s32.totalorder (!%p164_p2), %s1526_s23, 31  ;;  %1610 = vmatprep.subr.bf16.mxu1 (!%p164_p2), %v1847_v12  ;;  %vm291_vm0 = vcmask (!%p164_p2), 1040384  }
   0x7   : > { %v1568_v8 = vpack.c.bf16 (!%p164_p2), %v223_v4, %v221_v2  ;;  %v1570_v9 = vpack.c.bf16 (!%p164_p2), %v228_v6, %v226_v5  ;;  %v225_v10 = vld [vmem:[%s2637_s1 + $0x20] sm:$0xff] (!%p164_p2)  ;;  %v227_v11 = vld [vmem:[%s2637_s1 + $0x30] sm:$0xff] (!%p164_p2)  ;;  %v492_v14 = vld [vmem:[%s2638_s2 + $0x8] sm:$0xff] (!%p164_p2)  ;;  %vm242_vm1 = vcmask (!%p164_p2), 269312   ;;  %v232_v4 = vlaneseq (!%p164_p2)  ;;  %s1848_s25 = smov (!%p164_p2), 64   ;;  %s1849_s30 = smov (!%p164_p2), 3  }
   0x8   : > { %1567 = vmatprep.subr.bf16.mxu0 (!%p164_p2), %v1566_v3  ;;  %v491_v13 = vld [vmem:[%s2638_s2] sm:$0xff] (!%p164_p2)  ;;  %v1572_v15 = vpack.c.bf16 (!%p164_p2), %v227_v11, %v225_v10  ;;  %v493_v17 = vld [vmem:[%s2638_s2 + $0x10] sm:$0xff] (!%p164_p2)  ;;  %v494_v18 = vld [vmem:[%s2638_s2 + $0x18] sm:$0xff] (!%p164_p2)  ;;  %vm515_vm2 = vcmask (!%p164_p2), 523264   ;;  %vm1397_vm3 = vcmask (!%p164_p2), 7168   ;;  %vm1414_vm4 = vcmask (!%p164_p2), 15360  }
   0x9   : > { %1569 = vmatpush1.bf16.msra.mxu0 (!%p164_p2), %v1568_v8  ;;  %v1575_v16 = vpack.c.bf16 (!%p164_p2), %v492_v14, %v491_v13  ;;  %v230_v19 = vld [vmem:[%s2637_s1 + $0x48] sm:$0x1] (!%p164_p2)  ;;  %v1578_v20 = vpack.c.bf16 (!%p164_p2), %v494_v18, %v493_v17  ;;  %v229_v21 = vld [vmem:[%s2637_s1 + $0x40] sm:$0x1] (!%p164_p2)  ;;  %v497_v27 = vld [vmem:[%s2638_s2 + $0x30] sm:$0xff] (!%p164_p2)  ;;  %v233_v5 = vshrl.u32 (!%p164_p2), %v232_v4, 7 }
   0xa   : > { %1571 = vmatprep.subr.bf16.mxu0 (!%p164_p2), %v1570_v9  ;;  %v495_v23 = vld [vmem:[%s2638_s2 + $0x20] sm:$0xff] (!%p164_p2)  ;;  %v496_v24 = vld [vmem:[%s2638_s2 + $0x28] sm:$0xff] (!%p164_p2)  ;;  %v498_v28 = vld [vmem:[%s2638_s2 + $0x38] sm:$0xff] (!%p164_p2)  ;;  %vm1431_vm5 = vcmask (!%p164_p2), 23552   ;;  %vm1448_vm6 = vcmask (!%p164_p2), 31744  }
   0xb   : > { %1622 = vmatpush1.bf16.msra.mxu1 (!%p164_p2), %v1575_v16  ;;  %v1581_v25 = vpack.c.bf16 (!%p164_p2), %v496_v24, %v495_v23  ;;  %v1584_v29 = vpack.c.bf16 (!%p164_p2), %v498_v28, %v497_v27  ;;  %v499_v31 = vld [vmem:[%s2638_s2 + $0x40] sm:$0xff] (!%p164_p2)  ;;  %v500_v32 = vld [vmem:[%s2638_s2 + $0x48] sm:$0xff] (!%p164_p2)  ;;  %v501_v35 = vld [vmem:[%s2638_s2 + $0x50] sm:$0xff] (!%p164_p2)  ;;  %v234_v6 = vsub.s32 (!%p164_p2), 0, %v233_v5  ;;  %v238_v8 = vsub.s32 (!%p164_p2), 1, %v233_v5 }
   0xc   : > { %1611 = vmatprep.subr.bf16.mxu1 (!%p164_p2), %v1847_v12  ;;  %v1587_v33 = vpack.c.bf16 (!%p164_p2), %v500_v32, %v499_v31  ;;  %v502_v36 = vld [vmem:[%s2638_s2 + $0x58] sm:$0xff] (!%p164_p2)  ;;  %v503_v39 = vld [vmem:[%s2638_s2 + $0x60] sm:$0xff] (!%p164_p2)  ;;  %v504_v40 = vld [vmem:[%s2638_s2 + $0x68] sm:$0xff] (!%p164_p2) }
   0xd   : > { %s2642_s23 = smov (!%p190_p3, %s1526_s23), 31  ;;  %1573 = vmatpush1.bf16.msra.mxu0 %v1572_v15  ;;  %v1590_v37 = vpack.c.bf16 %v502_v36, %v501_v35  ;;  %v1593_v41 = vpack.c.bf16 %v504_v40, %v503_v39  ;;  %v505_v43 = vld [vmem:[%s2638_s2 + $0x70] sm:$0xff]  ;;  %v506_v44 = vld [vmem:[%s2638_s2 + $0x78] sm:$0xff]  ;;  %v507_v47 = vld [vmem:[%s2638_s2 + $0x80] sm:$0xff] }
   0xe   : > { %s1527_s12 = sshll.u32 %s2642_s23, 3  ;;  %1530 = vmatprep.subr.msk.mxu0 %vm291_vm0, %v230_v19  ;;  %v1596_v45 = vpack.c.bf16 %v506_v44, %v505_v43  ;;  %v508_v48 = vld [vmem:[%s2638_s2 + $0x88] sm:$0xff]  ;;  %v509_v51 = vld [vmem:[%s2638_s2 + $0x90] sm:$0xff]  ;;  %v510_v52 = vld [vmem:[%s2638_s2 + $0x98] sm:$0xff] }
   0xf   : > { %s1932_s22 = scalar_lea.vmem %s2636_s0, %s1527_s12  ;;  %1623 = vmatpush1.bf16.msra.mxu1 %v1578_v20  ;;  %v1599_v49 = vpack.c.bf16 %v508_v48, %v507_v47  ;;  %v1602_v53 = vpack.c.bf16 %v510_v52, %v509_v51  ;;  %v511_v55 = vld [vmem:[%s2638_s2 + $0xa0] sm:$0xff]  ;;  %v512_v56 = vld [vmem:[%s2638_s2 + $0xa8] sm:$0xff]  ;;  %v513_v1 = vld [vmem:[%s2638_s2 + $0xb0] sm:$0xff]  ;;  %s2518_s7 = scalar_lea.vmem %s2640_s4, %s1527_s12 }
  0x10   : > { %v201_v22 = vld [vmem:[%s1932_s22] sm:$0xff]  ;;  %1612 = vmatprep.subr.bf16.mxu1 %v1847_v12  ;;  %v202_v26 = vld [vmem:[%s1932_s22 + $0x8] sm:$0xff]  ;;  %v203_v30 = vld [vmem:[%s1932_s22 + $0x10] sm:$0xff]  ;;  %v1605_v57 = vpack.c.bf16 %v512_v56, %v511_v55 }
  0x11   : > { %1531 = vmatpush1.msk.msra.mxu0 %vm291_vm0, %v229_v21  ;;  %v204_v34 = vld [vmem:[%s1932_s22 + $0x18] sm:$0xff]  ;;  %v205_v38 = vld [vmem:[%s1932_s22 + $0x20] sm:$0xff]  ;;  %v206_v42 = vld [vmem:[%s1932_s22 + $0x28] sm:$0xff] }
  0x12   : > { %1532 = vmatmul.mubr.msk.f32.vlgmr.msra.gmra.mrb[0].mxu0 %vm242_vm1, %v201_v22  ;;  %1574 = vmatprep.subr.bf16.mxu0 %v1847_v12  ;;  %v207_v46 = vld [vmem:[%s1932_s22 + $0x30] sm:$0xff]  ;;  %v208_v50 = vld [vmem:[%s1932_s22 + $0x38] sm:$0xff]  ;;  %v209_v54 = vld [vmem:[%s1932_s22 + $0x40] sm:$0xff] }
  0x13   : > { %368 = vmatprep.mubr.f32.mxu0 %v1846_v7  ;;  %1576 = vmatpush1.bf16.msra.mxu0 %v1575_v16  ;;  %v210_v58 = vld [vmem:[%s1932_s22 + $0x48] sm:$0xff]  ;;  %v211_v59 = vld [vmem:[%s1932_s22 + $0x50] sm:$0xff]  ;;  %v212_v60 = vld [vmem:[%s1932_s22 + $0x58] sm:$0xff] }
  0x14   : > { %1577 = vmatprep.subr.bf16.mxu0 %v1847_v12  ;;  %1624 = vmatpush1.bf16.msra.mxu1 %v1581_v25  ;;  %v213_v61 = vld [vmem:[%s1932_s22 + $0x60] sm:$0xff]  ;;  %v214_v62 = vld [vmem:[%s1932_s22 + $0x68] sm:$0xff]  ;;  %v215_v63 = vld [vmem:[%s1932_s22 + $0x70] sm:$0xff] }
  0x15   : > { %1613 = vmatprep.subr.bf16.mxu1 %v1847_v12  ;;  %v216_v0 = vld [vmem:[%s1932_s22 + $0x78] sm:$0xff] }
  0x16   : > { %1533 = vmatmul.mubr.msk.f32.gmra.mrb[2].mxu0 %vm242_vm1, %v202_v26  ;;  %v514_v2 = vld [vmem:[%s2638_s2 + $0xb8] sm:$0xff] }
  0x17   : > { %374 = vmatprep.mubr.f32.mxu0 %v1846_v7  ;;  %1579 = vmatpush1.bf16.msra.mxu0 %v1578_v20  ;;  %v1608_v3 = vpack.c.bf16 %v514_v2, %v513_v1 }
  0x18   : > { %1580 = vmatprep.subr.bf16.mxu0 %v1847_v12  ;;  %1625 = vmatpush1.bf16.msra.mxu1 %v1584_v29 }
  0x19   : > { %1614 = vmatprep.subr.bf16.mxu1 %v1847_v12 }
  0x1a   : > { %1534 = vmatmul.mubr.msk.f32.gmra.mrb[4].mxu0 %vm242_vm1, %v203_v30 }
  0x1b   : > { %380 = vmatprep.mubr.f32.mxu0 %v1846_v7  ;;  %1582 = vmatpush1.bf16.msra.mxu0 %v1581_v25 }
  0x1c   : > { %1583 = vmatprep.subr.bf16.mxu0 %v1847_v12  ;;  %1626 = vmatpush1.bf16.msra.mxu1 %v1587_v33 }
  0x1d   : > { %1615 = vmatprep.subr.bf16.mxu1 %v1847_v12 }
  0x1e   : > { %1535 = vmatmul.mubr.msk.f32.gmra.mrb[6].mxu0 %vm242_vm1, %v204_v34 }
  0x1f   : > { %386 = vmatprep.mubr.f32.mxu0 %v1846_v7  ;;  %1585 = vmatpush1.bf16.msra.mxu0 %v1584_v29 }
  0x20   : > { %1586 = vmatprep.subr.bf16.mxu0 %v1847_v12  ;;  %1627 = vmatpush1.bf16.msra.mxu1 %v1590_v37 }
  0x21   : > { %1616 = vmatprep.subr.bf16.mxu1 %v1847_v12 }
  0x22   : > { %1536 = vmatmul.mubr.msk.f32.gmra.mrb[8].mxu0 %vm242_vm1, %v205_v38 }
  0x23   : > { %392 = vmatprep.mubr.f32.mxu0 %v1846_v7  ;;  %1588 = vmatpush1.bf16.msra.mxu0 %v1587_v33 }
  0x24   : > { %1589 = vmatprep.subr.bf16.mxu0 %v1847_v12  ;;  %1628 = vmatpush1.bf16.msra.mxu1 %v1593_v41 }
  0x25   : > { %1617 = vmatprep.subr.bf16.mxu1 %v1847_v12 }
  0x26   : > { %1537 = vmatmul.mubr.msk.f32.gmra.mrb[10].mxu0 %vm242_vm1, %v206_v42 }
  0x27   : > { %398 = vmatprep.mubr.f32.mxu0 %v1846_v7  ;;  %1591 = vmatpush1.bf16.msra.mxu0 %v1590_v37 }
  0x28   : > { %1592 = vmatprep.subr.bf16.mxu0 %v1847_v12  ;;  %1629 = vmatpush1.bf16.msra.mxu1 %v1596_v45 }
  0x29   : > { %1618 = vmatprep.subr.bf16.mxu1 %v1847_v12 }
  0x2a   : > { %1538 = vmatmul.mubr.msk.f32.gmra.mrb[12].mxu0 %vm242_vm1, %v207_v46 }
  0x2b   : > { %404 = vmatprep.mubr.f32.mxu0 %v1846_v7  ;;  %1594 = vmatpush1.bf16.msra.mxu0 %v1593_v41 }
  0x2c   : > { %1595 = vmatprep.subr.bf16.mxu0 %v1847_v12  ;;  %1630 = vmatpush1.bf16.msra.mxu1 %v1599_v49 }
  0x2d   : > { %1619 = vmatprep.subr.bf16.mxu1 %v1847_v12 }
  0x2e   : > { %1539 = vmatmul.mubr.msk.f32.gmra.mrb[14].mxu0 %vm242_vm1, %v208_v50 }
  0x2f   : > { %410 = vmatprep.mubr.f32.mxu0 %v1846_v7  ;;  %1597 = vmatpush1.bf16.msra.mxu0 %v1596_v45 }
  0x30   : > { %1598 = vmatprep.subr.bf16.mxu0 %v1847_v12  ;;  %1631 = vmatpush1.bf16.msra.mxu1 %v1602_v53 }
  0x31   : > { %1620 = vmatprep.subr.bf16.mxu1 %v1847_v12 }
  0x32   : > { %1540 = vmatmul.mubr.msk.f32.gmra.mrb[16].mxu0 %vm242_vm1, %v209_v54 }
  0x33   : > { %416 = vmatprep.mubr.f32.mxu0 %v1846_v7  ;;  %1600 = vmatpush1.bf16.msra.mxu0 %v1599_v49 }
  0x34   : > { %1601 = vmatprep.subr.bf16.mxu0 %v1847_v12  ;;  %1632 = vmatpush1.bf16.msra.mxu1 %v1605_v57 }
  0x35   : > { %1621 = vmatprep.subr.bf16.mxu1 %v1847_v12 }
  0x36   : > { %1541 = vmatmul.mubr.msk.f32.gmra.mrb[18].mxu0 %vm242_vm1, %v210_v58 }
  0x37   : > { %422 = vmatprep.mubr.f32.mxu0 %v1846_v7  ;;  %1603 = vmatpush1.bf16.msra.mxu0 %v1602_v53 }
  0x38   : > { %1604 = vmatprep.subr.bf16.mxu0 %v1847_v12  ;;  %1633 = vmatpush1.bf16.msra.mxu1 %v1608_v3 }
  0x3a   : > { %1542 = vmatmul.mubr.msk.f32.gmra.mrb[20].mxu0 %vm242_vm1, %v211_v59 }
  0x3b   : > { %428 = vmatprep.mubr.f32.mxu0 %v1846_v7  ;;  %1606 = vmatpush1.bf16.msra.mxu0 %v1605_v57 }
  0x3c   : > { %1607 = vmatprep.subr.bf16.mxu0 %v1847_v12 }
  0x3e   : > { %1543 = vmatmul.mubr.msk.f32.gmra.mrb[22].mxu0 %vm242_vm1, %v212_v60 }
  0x3f   : > { %434 = vmatprep.mubr.f32.mxu0 %v1846_v7  ;;  %1609 = vmatpush1.bf16.msra.mxu0 %v1608_v3 }
  0x42   : > { %1544 = vmatmul.mubr.msk.f32.gmra.mrb[24].mxu0 %vm242_vm1, %v213_v61 }
  0x43   : > { %440 = vmatprep.mubr.f32.mxu0 %v1846_v7 }
  0x46   : > { %1545 = vmatmul.mubr.msk.f32.gmra.mrb[26].mxu0 %vm242_vm1, %v214_v62 }
  0x47   : > { %446 = vmatprep.mubr.f32.mxu0 %v1846_v7 }
  0x4a   : > { %1546 = vmatmul.mubr.msk.f32.gmra.mrb[28].mxu0 %vm242_vm1, %v215_v63 }
  0x4b   : > { %452 = vmatprep.mubr.f32.mxu0 %v1846_v7  ;;  %v217_v7 = vld [vmem:[%s2639_s3] ss:$8 sm:$0x3] }
  0x4c   : > { %v2070_v9 = vrot.slane %v217_v7, %v234_v6  ;;  %v2072_v10 = vrot.slane %v217_v7, %v238_v8 }
  0x4e   : > { %1547 = vmatmul.mubr.msk.f32.gmra.mrb[30].mxu0 %vm242_vm1, %v216_v0 }
  0xe5   : > { %v364_v11 = vpop.f32.mrb[0].mxu0 }
  0xe6   : > { %v365_v12 = vadd.f32 %v364_v11, %v2070_v9  ;;  %v366_v13 = vpop.f32.mrb[1].mxu0 }
  0xe7   : > { %v367_v14 = vadd.f32 %v366_v13, %v2072_v10 }
  0xe8   : > { %v459_v17 = vmax.f32 %v365_v12, 0.0 }
  0xe9   : > { %v460_v15 = vmax.f32 %v367_v14, 0.0  ;;  %v370_v16 = vpop.f32.mrb[2].mxu0 }
  0xea   : > { %v371_v18 = vadd.f32 %v370_v16, %v2070_v9  ;;  %v372_v19 = vpop.f32.mrb[3].mxu0 }
  0xeb   : > { %v373_v20 = vadd.f32 %v372_v19, %v2072_v10  ;;  %1548 = vmatprep.mubr.msk.f32.mxu0 %vm515_vm2, %v460_v15 }
  0xec   : > { %v461_v21 = vmax.f32 %v371_v18, 0.0  ;;  %629 = vmatmul.mubr.f32.vlgmr.msra.gmra.mrb[32].mxu0 %v459_v17 }
  0xed   : > { %v462_v22 = vmax.f32 %v373_v20, 0.0  ;;  %v376_v23 = vpop.f32.mrb[4].mxu0 }
  0xee   : > { %v377_v24 = vadd.f32 %v376_v23, %v2070_v9  ;;  %v378_v25 = vpop.f32.mrb[5].mxu0 }
  0xef   : > { %v379_v26 = vadd.f32 %v378_v25, %v2072_v10  ;;  %1549 = vmatprep.mubr.msk.f32.mxu0 %vm515_vm2, %v462_v22 }
  0xf0   : > { %v463_v27 = vmax.f32 %v377_v24, 0.0  ;;  %634 = vmatmul.mubr.f32.gmra.mrb[34].mxu0 %v461_v21 }
  0xf1   : > { %v464_v28 = vmax.f32 %v379_v26, 0.0  ;;  %v382_v29 = vpop.f32.mrb[6].mxu0 }
  0xf2   : > { %v383_v30 = vadd.f32 %v382_v29, %v2070_v9  ;;  %v384_v31 = vpop.f32.mrb[7].mxu0 }
  0xf3   : > { %v385_v32 = vadd.f32 %v384_v31, %v2072_v10  ;;  %1550 = vmatprep.mubr.msk.f32.mxu0 %vm515_vm2, %v464_v28 }
  0xf4   : > { %v465_v33 = vmax.f32 %v383_v30, 0.0  ;;  %639 = vmatmul.mubr.f32.gmra.mrb[36].mxu0 %v463_v27 }
  0xf5   : > { %v466_v34 = vmax.f32 %v385_v32, 0.0  ;;  %v388_v35 = vpop.f32.mrb[8].mxu0 }
  0xf6   : > { %v389_v36 = vadd.f32 %v388_v35, %v2070_v9  ;;  %v390_v37 = vpop.f32.mrb[9].mxu0 }
  0xf7   : > { %1551 = vmatprep.mubr.msk.f32.mxu0 %vm515_vm2, %v466_v34  ;;  %v391_v38 = vadd.f32 %v390_v37, %v2072_v10 }
  0xf8   : > { %644 = vmatmul.mubr.f32.gmra.mrb[38].mxu0 %v465_v33  ;;  %v467_v39 = vmax.f32 %v389_v36, 0.0 }
  0xf9   : > { %v468_v40 = vmax.f32 %v391_v38, 0.0  ;;  %v394_v41 = vpop.f32.mrb[10].mxu0 }
  0xfa   : > { %v395_v42 = vadd.f32 %v394_v41, %v2070_v9  ;;  %v396_v43 = vpop.f32.mrb[11].mxu0 }
  0xfb   : > { %v397_v44 = vadd.f32 %v396_v43, %v2072_v10  ;;  %1552 = vmatprep.mubr.msk.f32.mxu1 %vm515_vm2, %v468_v40 }
  0xfc   : > { %v469_v45 = vmax.f32 %v395_v42, 0.0  ;;  %649 = vmatmul.mubr.f32.vlgmr.msra.gmra.mrb[0].mxu1 %v467_v39 }
  0xfd   : > { %v470_v46 = vmax.f32 %v397_v44, 0.0  ;;  %v400_v47 = vpop.f32.mrb[12].mxu0 }
  0xfe   : > { %v401_v48 = vadd.f32 %v400_v47, %v2070_v9  ;;  %v402_v49 = vpop.f32.mrb[13].mxu0 }
  0xff   : > { %1553 = vmatprep.mubr.msk.f32.mxu1 %vm515_vm2, %v470_v46  ;;  %v403_v50 = vadd.f32 %v402_v49, %v2072_v10 }
 0x100   : > { %654 = vmatmul.mubr.f32.gmra.mrb[2].mxu1 %v469_v45  ;;  %v471_v51 = vmax.f32 %v401_v48, 0.0  ;;  %v2125_v45 = vld [vmem:[%s2639_s3 + $0x1] ss:$0 sm:$0xff] }
 0x101   : > { %v472_v52 = vmax.f32 %v403_v50, 0.0  ;;  %v406_v53 = vpop.f32.mrb[14].mxu0 }
 0x102   : > { %v407_v54 = vadd.f32 %v406_v53, %v2070_v9  ;;  %v408_v55 = vpop.f32.mrb[15].mxu0 }
 0x103   : > { %v409_v56 = vadd.f32 %v408_v55, %v2072_v10  ;;  %1554 = vmatprep.mubr.msk.f32.mxu1 %vm515_vm2, %v472_v52 }
 0x104   : > { %v473_v57 = vmax.f32 %v407_v54, 0.0  ;;  %659 = vmatmul.mubr.f32.gmra.mrb[4].mxu1 %v471_v51 }
 0x105   : > { %v474_v58 = vmax.f32 %v409_v56, 0.0  ;;  %v412_v59 = vpop.f32.mrb[16].mxu0 }
 0x106   : > { %v413_v60 = vadd.f32 %v412_v59, %v2070_v9  ;;  %v414_v61 = vpop.f32.mrb[17].mxu0 }
 0x107   : > { %1555 = vmatprep.mubr.msk.f32.mxu1 %vm515_vm2, %v474_v58  ;;  %v415_v62 = vadd.f32 %v414_v61, %v2072_v10 }
 0x108   : > { %664 = vmatmul.mubr.f32.gmra.mrb[6].mxu1 %v473_v57  ;;  %v475_v63 = vmax.f32 %v413_v60, 0.0 }
 0x109   : > { %v476_v0 = vmax.f32 %v415_v62, 0.0  ;;  %v418_v1 = vpop.f32.mrb[18].mxu0 }
 0x10a   : > { %v419_v2 = vadd.f32 %v418_v1, %v2070_v9  ;;  %v420_v3 = vpop.f32.mrb[19].mxu0 }
 0x10b   : > { %v421_v4 = vadd.f32 %v420_v3, %v2072_v10  ;;  %1556 = vmatprep.mubr.msk.f32.mxu1 %vm515_vm2, %v476_v0 }
 0x10c   : > { %v477_v5 = vmax.f32 %v419_v2, 0.0  ;;  %669 = vmatmul.mubr.f32.gmra.mrb[8].mxu1 %v475_v63 }
 0x10d   : > { %v478_v6 = vmax.f32 %v421_v4, 0.0  ;;  %v424_v7 = vpop.f32.mrb[20].mxu0 }
 0x10e   : > { %v425_v8 = vadd.f32 %v424_v7, %v2070_v9  ;;  %v426_v11 = vpop.f32.mrb[21].mxu0 }
 0x10f   : > { %v427_v12 = vadd.f32 %v426_v11, %v2072_v10  ;;  %1557 = vmatprep.mubr.msk.f32.mxu1 %vm515_vm2, %v478_v6 }
 0x110   : > { %v479_v13 = vmax.f32 %v425_v8, 0.0  ;;  %674 = vmatmul.mubr.f32.gmra.mrb[10].mxu1 %v477_v5 }
 0x111   : > { %v480_v14 = vmax.f32 %v427_v12, 0.0  ;;  %v430_v15 = vpop.f32.mrb[22].mxu0 }
 0x112   : > { %v431_v16 = vadd.f32 %v430_v15, %v2070_v9  ;;  %v432_v17 = vpop.f32.mrb[23].mxu0 }
 0x113   : > { %v433_v18 = vadd.f32 %v432_v17, %v2072_v10  ;;  %1558 = vmatprep.mubr.msk.f32.mxu1 %vm515_vm2, %v480_v14 }
 0x114   : > { %v481_v19 = vmax.f32 %v431_v16, 0.0  ;;  %679 = vmatmul.mubr.f32.gmra.mrb[12].mxu1 %v479_v13 }
 0x115   : > { %v482_v20 = vmax.f32 %v433_v18, 0.0  ;;  %v436_v21 = vpop.f32.mrb[24].mxu0 }
 0x116   : > { %v437_v22 = vadd.f32 %v436_v21, %v2070_v9  ;;  %v438_v23 = vpop.f32.mrb[25].mxu0 }
 0x117   : > { %v439_v24 = vadd.f32 %v438_v23, %v2072_v10  ;;  %1559 = vmatprep.mubr.msk.f32.mxu1 %vm515_vm2, %v482_v20 }
 0x118   : > { %v483_v25 = vmax.f32 %v437_v22, 0.0  ;;  %684 = vmatmul.mubr.f32.gmra.mrb[14].mxu1 %v481_v19  ;;  %v2163_v22 = vld [vmem:[%s2639_s3 + $0x2] ss:$0 sm:$0xff] }
 0x119   : > { %v484_v26 = vmax.f32 %v439_v24, 0.0  ;;  %v442_v27 = vpop.f32.mrb[26].mxu0 }
 0x11a   : > { %v443_v28 = vadd.f32 %v442_v27, %v2070_v9  ;;  %v444_v29 = vpop.f32.mrb[27].mxu0 }
 0x11b   : > { %v445_v30 = vadd.f32 %v444_v29, %v2072_v10  ;;  %1560 = vmatprep.mubr.msk.f32.mxu1 %vm515_vm2, %v484_v26 }
 0x11c   : > { %v485_v31 = vmax.f32 %v443_v28, 0.0  ;;  %689 = vmatmul.mubr.f32.gmra.mrb[16].mxu1 %v483_v25 }
 0x11d   : > { %v486_v32 = vmax.f32 %v445_v30, 0.0  ;;  %v448_v33 = vpop.f32.mrb[28].mxu0 }
 0x11e   : > { %v449_v34 = vadd.f32 %v448_v33, %v2070_v9  ;;  %v450_v35 = vpop.f32.mrb[29].mxu0 }
 0x11f   : > { %v451_v36 = vadd.f32 %v450_v35, %v2072_v10  ;;  %1561 = vmatprep.mubr.msk.f32.mxu1 %vm515_vm2, %v486_v32 }
 0x120   : > { %v487_v37 = vmax.f32 %v449_v34, 0.0  ;;  %694 = vmatmul.mubr.f32.gmra.mrb[18].mxu1 %v485_v31 }
 0x121   : > { %v488_v38 = vmax.f32 %v451_v36, 0.0  ;;  %v454_v39 = vpop.f32.mrb[30].mxu0 }
 0x122   : > { %v455_v40 = vadd.f32 %v454_v39, %v2070_v9  ;;  %v456_v41 = vpop.f32.mrb[31].mxu0 }
 0x123   : > { %v457_v42 = vadd.f32 %v456_v41, %v2072_v10  ;;  %1562 = vmatprep.mubr.msk.f32.mxu1 %vm515_vm2, %v488_v38 }
 0x124   : > { %v489_v43 = vmax.f32 %v455_v40, 0.0  ;;  %699 = vmatmul.mubr.f32.gmra.mrb[20].mxu1 %v487_v37 }
 0x125   : > { %v490_v44 = vmax.f32 %v457_v42, 0.0 }
 0x127   : > { %1563 = vmatprep.mubr.msk.f32.mxu1 %vm515_vm2, %v490_v44 }
 0x128   : > { %704 = vmatmul.mubr.f32.gmra.mrb[22].mxu1 %v489_v43 }
 0x1bf   : > { %v630_v46 = vpop.f32.mrb[32].mxu0 }
 0x1c0   : > { %v2128_v47 = vadd.f32 %v630_v46, %v2125_v45  ;;  %v632_v9 = vpop.f32.mrb[33].mxu0 }
 0x1c2   : > { %v821_v10 = vand.u32 2147483647, %v2128_v47  ;;  %1221 = vrot.lane.b32.xlu0 %v2128_v47, %s1848_s25  ;;  %v709_v18 = vmax.f32 %v2128_v47, 0.0 }
 0x1c3   : > { %v635_v48 = vpop.f32.mrb[34].mxu0 }
 0x1c4   : > { %v837_v49 = vsub.f32 0.0, %v821_v10  ;;  %v2134_v50 = vadd.f32 %v635_v48, %v2125_v45  ;;  %v637_v51 = vpop.f32.mrb[35].mxu0  ;;  %v965_v27 = vmul.f32 %v709_v18, %v2163_v22 }
 0x1c6   : > { %v853_v52 = vmul.f32 1.442695, %v837_v49  ;;  %v822_v53 = vand.u32 2147483647, %v2134_v50  ;;  %1223 = vrot.lane.b32.xlu1 %v2134_v50, %s1848_s25  ;;  %v981_v34 = vsel %vm515_vm2, %v965_v27, 0.0  ;;  %v710_v43 = vmax.f32 %v2134_v50, 0.0 }
 0x1c7   : > { %v640_v54 = vpop.f32.mrb[36].mxu0 }
 0x1c8   : > { %1646 = vpow2.f32 %v853_v52  ;;  %v838_v55 = vsub.f32 0.0, %v822_v53  ;;  %v2140_v56 = vadd.f32 %v640_v54, %v2125_v45  ;;  %v642_v57 = vpop.f32.mrb[37].mxu0  ;;  %v966_v27 = vmul.f32 %v710_v43, %v2163_v22 }
 0x1ca   : > { %v855_v58 = vmul.f32 1.442695, %v838_v55  ;;  %v823_v59 = vand.u32 2147483647, %v2140_v56  ;;  %v711_v53 = vmax.f32 %v2140_v56, 0.0 }
 0x1cb   : > { %v645_v60 = vpop.f32.mrb[38].mxu0 }
 0x1cc   : > { %1648 = vpow2.f32 %v855_v58  ;;  %v839_v61 = vsub.f32 0.0, %v823_v59  ;;  %v2144_v62 = vadd.f32 %v645_v60, %v2125_v45  ;;  %v647_v63 = vpop.f32.mrb[39].mxu0 }
 0x1ce   : > { %v857_v0 = vmul.f32 1.442695, %v839_v61  ;;  %v824_v1 = vand.u32 2147483647, %v2144_v62  ;;  %1227 = vrot.lane.b32.xlu1 %v2144_v62, %s1848_s25  ;;  %v967_v61 = vmul.f32 %v711_v53, %v2163_v22  ;;  %v712_v63 = vmax.f32 %v2144_v62, 0.0 }
 0x1cf   : > { %v650_v2 = vpop.f32.mrb[0].mxu1 }
 0x1d0   : > { %1650 = vpow2.f32 %v857_v0  ;;  %v840_v3 = vsub.f32 0.0, %v824_v1  ;;  %v2150_v4 = vadd.f32 %v650_v2, %v2125_v45  ;;  %v652_v5 = vpop.f32.mrb[1].mxu1 }
 0x1d2   : > { %v1647_v6 = vpop.eup %1646  ;;  %v859_v7 = vmul.f32 1.442695, %v840_v3 }
 0x1d3   : > { %v655_v8 = vpop.f32.mrb[2].mxu1  ;;  %v885_v11 = vadd.f32 1.0, %v1647_v6  ;;  %v987_v6 = vsel %vm515_vm2, %v967_v61, 0.0 }
 0x1d4   : > { %1652 = vpow2.f32 %v859_v7  ;;  %v2153_v12 = vadd.f32 %v655_v8, %v2125_v45  ;;  %v657_v13 = vpop.f32.mrb[3].mxu1  ;;  %v968_v7 = vmul.f32 %v712_v63, %v2163_v22 }
 0x1d5   : > { %1654 = vlog2.f32 %v885_v11 }
 0x1d6   : > { %v1649_v14 = vpop.eup %1648  ;;  %v826_v15 = vand.u32 2147483647, %v2153_v12  ;;  %v714_v11 = vmax.f32 %v2153_v12, 0.0 }
 0x1d7   : > { %v660_v16 = vpop.f32.mrb[4].mxu1  ;;  %v886_v17 = vadd.f32 1.0, %v1649_v14 }
 0x1d8   : > { %v842_v19 = vsub.f32 0.0, %v826_v15  ;;  %v2158_v20 = vadd.f32 %v660_v16, %v2125_v45  ;;  %v662_v21 = vpop.f32.mrb[5].mxu1  ;;  %v990_v16 = vsel %vm515_vm2, %v968_v7, 0.0 }
 0x1d9   : > { %1656 = vlog2.f32 %v886_v17 }
 0x1da   : > { %v1651_v23 = vpop.eup %1650  ;;  %v863_v24 = vmul.f32 1.442695, %v842_v19  ;;  %v715_v61 = vmax.f32 %v2158_v20, 0.0 }
 0x1db   : > { %v665_v25 = vpop.f32.mrb[6].mxu1  ;;  %v887_v26 = vadd.f32 1.0, %v1651_v23 }
 0x1dc   : > { %1658 = vpow2.f32 %v863_v24  ;;  %v2167_v28 = vadd.f32 %v665_v25, %v2125_v45  ;;  %v667_v29 = vpop.f32.mrb[7].mxu1 }
 0x1dd   : > { %1660 = vlog2.f32 %v887_v26  ;;  %v984_v29 = vsel %vm515_vm2, %v966_v27, 0.0 }
 0x1de   : > { %v1653_v30 = vpop.eup %1652 }
 0x1df   : > { %v1655_v31 = vpop.eup %1654  ;;  %v670_v32 = vpop.f32.mrb[8].mxu1  ;;  %v888_v33 = vadd.f32 1.0, %v1653_v30  ;;  %v726_v30 = vsub.f32 0.0, %v2134_v50  ;;  %v725_v50 = vsub.f32 0.0, %v2128_v47  ;;  %v716_v47 = vmax.f32 %v2167_v28, 0.0 }
 0x1e0   : > { %v2171_v35 = vadd.f32 %v670_v32, %v2125_v45  ;;  %v672_v36 = vpop.f32.mrb[9].mxu1  ;;  %v902_v37 = vmul.f32 0.6931472, %v1655_v31  ;;  %v970_v32 = vmul.f32 %v714_v11, %v2163_v22 }
 0x1e1   : > { %982 = vadd.xlane.f32.xlu0 %v981_v34  ;;  %1662 = vlog2.f32 %v888_v33  ;;  %v743_v31 = vmul.f32 1.442695, %v726_v30 }
 0x1e2   : > { %v2173_v40 = vadd.f32 %v902_v37, %v709_v18  ;;  %v996_v33 = vsel %vm515_vm2, %v970_v32, 0.0  ;;  %v713_v37 = vmax.f32 %v2150_v4, 0.0 }
 0x1e3   : > { %v1657_v38 = vpop.eup %1656  ;;  %v675_v39 = vpop.f32.mrb[10].mxu1 }
 0x1e4   : > { %v2176_v41 = vadd.f32 %v675_v39, %v2125_v45  ;;  %v677_v42 = vpop.f32.mrb[11].mxu1  ;;  %v904_v44 = vmul.f32 0.6931472, %v1657_v38  ;;  %v741_v38 = vmul.f32 1.442695, %v725_v50  ;;  %v969_v39 = vmul.f32 %v713_v37, %v2163_v22 }
 0x1e5   : > { %v731_v50 = vsub.f32 0.0, %v2158_v20 }
 0x1e6   : > { %v1659_v46 = vpop.eup %1658  ;;  %v2179_v48 = vadd.f32 %v904_v44, %v710_v43  ;;  %v993_v42 = vsel %vm515_vm2, %v969_v39, 0.0  ;;  %v727_v43 = vsub.f32 0.0, %v2140_v56  ;;  %v718_v7 = vmax.f32 %v2176_v41, 0.0 }
 0x1e7   : > { %v1661_v9 = vpop.eup %1660  ;;  %v680_v10 = vpop.f32.mrb[12].mxu1  ;;  %v890_v49 = vadd.f32 1.0, %v1659_v46  ;;  %v753_v39 = vmul.f32 1.442695, %v731_v50 }
 0x1e8   : > { %v2182_v51 = vadd.f32 %v680_v10, %v2125_v45  ;;  %v682_v52 = vpop.f32.mrb[13].mxu1  ;;  %v906_v54 = vmul.f32 0.6931472, %v1661_v9  ;;  %v745_v46 = vmul.f32 1.442695, %v727_v43  ;;  %v728_v10 = vsub.f32 0.0, %v2144_v62 }
 0x1e9   : > { %1664 = vlog2.f32 %v890_v49  ;;  %v972_v52 = vmul.f32 %v716_v47, %v2163_v22 }
 0x1ea   : > { %v2185_v58 = vadd.f32 %v906_v54, %v711_v53  ;;  %1666 = vpow2.f32 %v743_v31  ;;  %v747_v49 = vmul.f32 1.442695, %v728_v10  ;;  %v734_v10 = vsub.f32 0.0, %v2176_v41 }
 0x1eb   : > { %v1663_v55 = vpop.eup %1662  ;;  %v685_v57 = vpop.f32.mrb[14].mxu1 }
 0x1ec   : > { %v2188_v59 = vadd.f32 %v685_v57, %v2125_v45  ;;  %v687_v60 = vpop.f32.mrb[15].mxu1  ;;  %v908_v0 = vmul.f32 0.6931472, %v1663_v55 }
 0x1ee   : > { %v2192_v2 = vadd.f32 %v908_v0, %v712_v63  ;;  %v971_v0 = vmul.f32 %v715_v61, %v2163_v22  ;;  %v720_v31 = vmax.f32 %v2188_v59, 0.0 }
 0x1ef   : > { %v690_v1 = vpop.f32.mrb[16].mxu1 }
 0x1f0   : > { %v2195_v3 = vadd.f32 %v690_v1, %v2125_v45  ;;  %v692_v5 = vpop.f32.mrb[17].mxu1  ;;  %v999_v1 = vsel %vm515_vm2, %v971_v0, 0.0 }
 0x1f1   : > { %v730_v5 = vsub.f32 0.0, %v2153_v12 }
 0x1f2   : > { %988 = vadd.xlane.f32.xlu1 %v987_v6 }
 0x1f3   : > { %v1665_v8 = vpop.eup %1664  ;;  %v695_v13 = vpop.f32.mrb[18].mxu1  ;;  %v751_v6 = vmul.f32 1.442695, %v730_v5 }
 0x1f4   : > { %v2201_v14 = vadd.f32 %v695_v13, %v2125_v45  ;;  %v697_v15 = vpop.f32.mrb[19].mxu1  ;;  %v912_v17 = vmul.f32 0.6931472, %v1665_v8  ;;  %v974_v8 = vmul.f32 %v718_v7, %v2163_v22 }
 0x1f6   : > { %991 = vadd.xlane.f32.xlu1 %v990_v16  ;;  %v2206_v19 = vadd.f32 %v912_v17, %v714_v11  ;;  %v1008_v11 = vsel %vm515_vm2, %v974_v8, 0.0  ;;  %v729_v16 = vsub.f32 0.0, %v2150_v4 }
 0x1f7   : > { %1225 = vrot.lane.b32.xlu0 %v2140_v56, %s1848_s25  ;;  %v700_v18 = vpop.f32.mrb[20].mxu1  ;;  %v1002_v56 = vsel %vm515_vm2, %v972_v52, 0.0 }
 0x1f8   : > { %v2209_v21 = vadd.f32 %v700_v18, %v2125_v45  ;;  %v702_v23 = vpop.f32.mrb[21].mxu1  ;;  %v749_v17 = vmul.f32 1.442695, %v729_v16 }
 0x1fb   : > { %v705_v24 = vpop.f32.mrb[22].mxu1 }
 0x1fc   : > { %v2212_v25 = vadd.f32 %v705_v24, %v2125_v45  ;;  %v707_v26 = vpop.f32.mrb[23].mxu1  ;;  %v1667_v45 = vpop.eup %1666 }
 0x1fd   : > { %v774_v34 = vadd.f32 1.0, %v1667_v45 }
 0x1ff   : > { %1668 = vrcp.f32 %v774_v34 }
 0x200   : > { %1670 = vpow2.f32 %v741_v38  ;;  %v719_v38 = vmax.f32 %v2182_v51, 0.0 }
 0x201   : > { %1672 = vpow2.f32 %v745_v46 }
 0x207   : > { %1231 = vrot.lane.b32.xlu1 %v2153_v12, %s1848_s25  ;;  %v717_v12 = vmax.f32 %v2171_v35, 0.0 }
 0x209   : > { %v1669_v36 = vpop.eup %1668  ;;  %v973_v18 = vmul.f32 %v717_v12, %v2163_v22 }
 0x20a   : > { %v1671_v44 = vpop.eup %1670 }
 0x20b   : > { %v773_v9 = vadd.f32 1.0, %v1671_v44  ;;  %v1673_v53 = vpop.eup %1672  ;;  %v1005_v24 = vsel %vm515_vm2, %v973_v18, 0.0 }
 0x20c   : > { %v775_v62 = vadd.f32 1.0, %v1673_v53  ;;  %v759_v53 = vmul.f32 1.442695, %v734_v10 }
 0x20d   : > { %1674 = vrcp.f32 %v773_v9 }
 0x20e   : > { %1676 = vpow2.f32 %v747_v49  ;;  %v722_v49 = vmax.f32 %v2201_v14, 0.0 }
 0x20f   : > { %1678 = vrcp.f32 %v775_v62 }
 0x216   : > { %985 = vadd.xlane.f32.xlu0 %v984_v29  ;;  %v732_v29 = vsub.f32 0.0, %v2167_v28 }
 0x217   : > { %v1675_v54 = vpop.eup %1674 }
 0x218   : > { %v1677_v55 = vpop.eup %1676  ;;  %v755_v30 = vmul.f32 1.442695, %v732_v29 }
 0x219   : > { %v776_v57 = vadd.f32 1.0, %v1677_v55  ;;  %v1679_v60 = vpop.eup %1678 }
 0x21b   : > { %1680 = vrcp.f32 %v776_v57  ;;  %v733_v57 = vsub.f32 0.0, %v2171_v35 }
 0x21c   : > { %1682 = vpow2.f32 %v751_v6 }
 0x225   : > { %v1681_v63 = vpop.eup %1680 }
 0x226   : > { %v1683_v13 = vpop.eup %1682 }
 0x227   : > { %v778_v15 = vadd.f32 1.0, %v1683_v13 }
 0x229   : > { %1684 = vrcp.f32 %v778_v15 }
 0x22a   : > { %1686 = vpow2.f32 %v749_v17 }
 0x22b   : > { %997 = vadd.xlane.f32.xlu1 %v996_v33  ;;  %v976_v33 = vmul.f32 %v720_v31, %v2163_v22 }
 0x22c   : > { %1229 = vrot.lane.b32.xlu0 %v2150_v4, %s1848_s25 }
 0x22d   : > { %v1014_v45 = vsel %vm515_vm2, %v976_v33, 0.0 }
 0x233   : > { %v1685_v23 = vpop.eup %1684 }
 0x234   : > { %v1687_v26 = vpop.eup %1686  ;;  %v2336_v10 = vpop.permute.xlu0 %1221 }
 0x235   : > { %v777_v27 = vadd.f32 1.0, %v1687_v26 }
 0x237   : > { %1688 = vrcp.f32 %v777_v27  ;;  %v830_v27 = vand.u32 2147483647, %v2176_v41 }
 0x238   : > { %1690 = vpow2.f32 %v755_v30  ;;  %v2299_v0 = vpop.permute.xlu1 %1223 }
 0x239   : > { %v846_v29 = vsub.f32 0.0, %v830_v27 }
 0x23b   : > { %v871_v33 = vmul.f32 1.442695, %v846_v29 }
 0x23c   : > { %1235 = vrot.lane.b32.xlu1 %v2167_v28, %s1848_s25 }
 0x240   : > { %1159 = vrot.lane.b32.xlu1 %v1669_v36, %s1848_s25  ;;  %v2306_v6 = vpop.permute.xlu1 %1227 }
 0x241   : > { %v1689_v32 = vpop.eup %1688 }
 0x242   : > { %v1691_v34 = vpop.eup %1690 }
 0x243   : > { %v780_v36 = vadd.f32 1.0, %v1691_v34  ;;  %v736_v34 = vsub.f32 0.0, %v2188_v59 }
 0x245   : > { %1692 = vrcp.f32 %v780_v36  ;;  %v724_v36 = vmax.f32 %v2212_v25, 0.0 }
 0x246   : > { %1694 = vpow2.f32 %v753_v39 }
 0x24b   : > { %994 = vadd.xlane.f32.xlu0 %v993_v42  ;;  %v975_v42 = vmul.f32 %v719_v38, %v2163_v22 }
 0x24d   : > { %v1011_v44 = vsel %vm515_vm2, %v975_v42, 0.0 }
 0x24f   : > { %v1693_v43 = vpop.eup %1692 }
 0x250   : > { %v1695_v46 = vpop.eup %1694 }
 0x251   : > { %v779_v9 = vadd.f32 1.0, %v1695_v46  ;;  %v980_v46 = vmul.f32 %v724_v36, %v2163_v22 }
 0x253   : > { %1696 = vrcp.f32 %v779_v9 }
 0x254   : > { %1698 = vpow2.f32 %v759_v53  ;;  %v834_v53 = vand.u32 2147483647, %v2201_v14 }
 0x25d   : > { %v1697_v52 = vpop.eup %1696 }
 0x25e   : > { %v1699_v62 = vpop.eup %1698 }
 0x25f   : > { %v782_v55 = vadd.f32 1.0, %v1699_v62  ;;  %v1026_v62 = vsel %vm515_vm2, %v980_v46, 0.0  ;;  %v723_v46 = vmax.f32 %v2209_v21, 0.0 }
 0x261   : > { %1233 = vrot.lane.b32.xlu0 %v2158_v20, %s1848_s25  ;;  %1700 = vrcp.f32 %v782_v55  ;;  %v738_v55 = vsub.f32 0.0, %v2201_v14 }
 0x264   : > { %1003 = vadd.xlane.f32.xlu1 %v1002_v56  ;;  %v978_v56 = vmul.f32 %v722_v49, %v2163_v22 }
 0x265   : > { %1157 = vrot.lane.b32.xlu0 %v1675_v54, %s1848_s25 }
 0x266   : > { %v1020_v54 = vsel %vm515_vm2, %v978_v56, 0.0 }
 0x275   : > { %1161 = vrot.lane.b32.xlu1 %v1679_v60, %s1848_s25  ;;  %v721_v60 = vmax.f32 %v2195_v3, 0.0 }
 0x277   : > { %v977_v5 = vmul.f32 %v721_v60, %v2163_v22 }
 0x279   : > { %1239 = vrot.lane.b32.xlu1 %v2176_v41, %s1848_s25  ;;  %v1017_v8 = vsel %vm515_vm2, %v977_v5, 0.0  ;;  %v827_v5 = vand.u32 2147483647, %v2158_v20 }
 0x27d   : > { %1163 = vrot.lane.b32.xlu1 %v1681_v63, %s1848_s25  ;;  %v757_v63 = vmul.f32 1.442695, %v733_v57  ;;  %v850_v57 = vsub.f32 0.0, %v834_v53 }
 0x27f   : > { %1702 = vpow2.f32 %v757_v63  ;;  %v2310_v13 = vpop.xlane.xlu1 %988  ;;  %v2341_v63 = vpop.xlane.xlu0 %982 }
 0x283   : > { %v2312_v16 = vpop.xlane.xlu1 %991  ;;  %v2347_v29 = vpop.permute.xlu0 %1225 }
 0x284   : > { %1000 = vadd.xlane.f32.xlu0 %v999_v1  ;;  %v950_v1 = vadd.f32 1e-06, %v2179_v48  ;;  %v828_v48 = vand.u32 2147483647, %v2167_v28 }
 0x287   : > { %v2315_v18 = vpop.permute.xlu1 %1231 }
 0x29a   : > { %1237 = vrot.lane.b32.xlu0 %v2171_v35, %s1848_s25 }
 0x2a1   : > { %1009 = vadd.xlane.f32.xlu1 %v1008_v11  ;;  %v1701_v11 = vpop.eup %1700 }
 0x2a2   : > { %v1703_v15 = vpop.eup %1702 }
 0x2a3   : > { %v781_v17 = vadd.f32 1.0, %v1703_v15 }
 0x2a5   : > { %1704 = vrcp.f32 %v781_v17  ;;  %v879_v17 = vmul.f32 1.442695, %v850_v57  ;;  %v952_v57 = vadd.f32 1e-06, %v2192_v2 }
 0x2b2   : > { %1243 = vrot.lane.b32.xlu1 %v2188_v59, %s1848_s25 }
 0x2b6   : > { %1167 = vrot.lane.b32.xlu1 %v1685_v23, %s1848_s25  ;;  %v844_v23 = vsub.f32 0.0, %v828_v48  ;;  %v767_v48 = vmul.f32 1.442695, %v738_v55 }
 0x2b8   : > { %v867_v26 = vmul.f32 1.442695, %v844_v23 }
 0x2b9   : > { %1006 = vadd.xlane.f32.xlu0 %v1005_v24  ;;  %v2317_v24 = vpop.xlane.xlu1 %997 }
 0x2ba   : > { %1706 = vpow2.f32 %v867_v26  ;;  %v843_v26 = vsub.f32 0.0, %v827_v5 }
 0x2bb   : > { %1708 = vpow2.f32 %v871_v33 }
 0x2bd   : > { %v2322_v30 = vpop.permute.xlu1 %1235 }
 0x2c1   : > { %v2328_v50 = vpop.permute.xlu1 %1159 }
 0x2cf   : > { %1241 = vrot.lane.b32.xlu0 %v2182_v51, %s1848_s25 }
 0x2d3   : > { %1165 = vrot.lane.b32.xlu0 %v1689_v32, %s1848_s25  ;;  %v1705_v32 = vpop.eup %1704 }
 0x2d4   : > { %v1707_v42 = vpop.eup %1706 }
 0x2d5   : > { %v892_v56 = vadd.f32 1.0, %v1707_v42  ;;  %v829_v42 = vand.u32 2147483647, %v2171_v35 }
 0x2da   : > { %1015 = vadd.xlane.f32.xlu1 %v1014_v45  ;;  %v832_v45 = vand.u32 2147483647, %v2188_v59 }
 0x2dc   : > { %v848_v39 = vsub.f32 0.0, %v832_v45  ;;  %v740_v45 = vsub.f32 0.0, %v2212_v25 }
 0x2eb   : > { %1247 = vrot.lane.b32.xlu1 %v2201_v14, %s1848_s25 }
 0x2ef   : > { %1171 = vrot.lane.b32.xlu1 %v1693_v43, %s1848_s25  ;;  %v825_v43 = vand.u32 2147483647, %v2150_v4 }
 0x2f1   : > { %v2334_v9 = vpop.xlane.xlu1 %1003 }
 0x2f2   : > { %1012 = vadd.xlane.f32.xlu0 %v1011_v44  ;;  %v763_v44 = vmul.f32 1.442695, %v736_v34 }
 0x2f4   : > { %1710 = vpow2.f32 %v763_v44  ;;  %v986_v44 = vpop.xlane.xlu0 %985 }
 0x2f8   : > { %v2368_v2 = vpop.permute.xlu0 %1229 }
 0x308   : > { %1245 = vrot.lane.b32.xlu0 %v2195_v3, %s1848_s25 }
 0x30c   : > { %1169 = vrot.lane.b32.xlu0 %v1697_v52, %s1848_s25  ;;  %v875_v52 = vmul.f32 1.442695, %v848_v39  ;;  %v865_v39 = vmul.f32 1.442695, %v843_v26 }
 0x30e   : > { %1712 = vpow2.f32 %v875_v52 }
 0x30f   : > { %1714 = vlog2.f32 %v892_v56  ;;  %v771_v56 = vmul.f32 1.442695, %v740_v45 }
 0x313   : > { %1021 = vadd.xlane.f32.xlu1 %v1020_v54  ;;  %v841_v54 = vsub.f32 0.0, %v825_v43 }
 0x315   : > { %v861_v15 = vmul.f32 1.442695, %v841_v54  ;;  %v845_v54 = vsub.f32 0.0, %v829_v42 }
 0x317   : > { %1716 = vpow2.f32 %v861_v15  ;;  %v831_v15 = vand.u32 2147483647, %v2182_v51  ;;  %v869_v26 = vmul.f32 1.442695, %v845_v54  ;;  %v2377_v54 = vpop.xlane.xlu0 %994 }
 0x318   : > { %1718 = vpow2.f32 %v767_v48  ;;  %v2365_v48 = vld [vmem:[%s2639_s3 + $0x3] ss:$0 sm:$0xff] }
 0x319   : > { %1720 = vpow2.f32 %v879_v17 }
 0x324   : > { %1251 = vrot.lane.b32.xlu1 %v2212_v25, %s1848_s25 }
 0x328   : > { %1287 = vrot.lane.b32.xlu1 %v950_v1, %s1848_s25  ;;  %v836_v1 = vand.u32 2147483647, %v2212_v25 }
 0x32a   : > { %v852_v23 = vsub.f32 0.0, %v836_v1  ;;  %v979_v1 = vmul.f32 %v723_v46, %v2163_v22 }
 0x32b   : > { %1018 = vadd.xlane.f32.xlu0 %v1017_v8  ;;  %v2345_v8 = vpop.permute.xlu1 %1161 }
 0x32c   : > { %1175 = vrot.lane.b32.xlu1 %v1701_v11, %s1848_s25  ;;  %v1709_v11 = vpop.eup %1708  ;;  %v883_v34 = vmul.f32 1.442695, %v852_v23  ;;  %v1030_v23 = vadd.f32 %v986_v44, %v2365_v48  ;;  %v1023_v45 = vsel %vm515_vm2, %v979_v1, 0.0 }
 0x32d   : > { %v894_v27 = vadd.f32 1.0, %v1709_v11  ;;  %v1711_v33 = vpop.eup %1710  ;;  %v735_v11 = vsub.f32 0.0, %v2182_v51 }
 0x32e   : > { %v1713_v43 = vpop.eup %1712  ;;  %v784_v53 = vadd.f32 1.0, %v1711_v33 }
 0x32f   : > { %1722 = vlog2.f32 %v894_v27  ;;  %v1715_v52 = vpop.eup %1714  ;;  %v896_v55 = vadd.f32 1.0, %v1713_v43  ;;  %v761_v43 = vmul.f32 1.442695, %v735_v11 }
 0x330   : > { %1724 = vpow2.f32 %v883_v34  ;;  %v916_v5 = vmul.f32 0.6931472, %v1715_v52  ;;  %v1717_v17 = vpop.eup %1716  ;;  %v954_v34 = vadd.f32 1e-06, %v2206_v19  ;;  %v847_v52 = vsub.f32 0.0, %v831_v15 }
 0x331   : > { %1726 = vpow2.f32 %v865_v39  ;;  %v1719_v22 = vpop.eup %1718  ;;  %v889_v28 = vadd.f32 1.0, %v1717_v17  ;;  %v2386_v17 = vpop.permute.xlu0 %1233 }
 0x332   : > { %1728 = vrcp.f32 %v784_v53  ;;  %v1721_v33 = vpop.eup %1720  ;;  %v940_v39 = vadd.f32 %v916_v5, %v716_v47  ;;  %v786_v44 = vadd.f32 1.0, %v1719_v22  ;;  %v1032_v53 = vadd.f32 %v2312_v16, %v2365_v48 }
 0x333   : > { %1730 = vpow2.f32 %v771_v56  ;;  %v1046_v56 = vsub.f32 0.0, %v1030_v23  ;;  %v873_v5 = vmul.f32 1.442695, %v847_v52  ;;  %v1034_v16 = vadd.f32 %v2317_v24, %v2365_v48 }
 0x334   : > { %1732 = vlog2.f32 %v896_v55  ;;  %v898_v55 = vadd.f32 1.0, %v1721_v33  ;;  %v956_v19 = vadd.f32 1e-06, %v940_v39  ;;  %v1048_v15 = vsub.f32 0.0, %v1032_v53 }
 0x335   : > { %1734 = vpow2.f32 %v869_v26  ;;  %v1063_v22 = vmul.f32 1.442695, %v1046_v56  ;;  %v833_v26 = vand.u32 2147483647, %v2195_v3  ;;  %v1050_v52 = vsub.f32 0.0, %v1034_v16 }
 0x336   : > { %1736 = vpow2.f32 %v761_v43  ;;  %v737_v43 = vsub.f32 0.0, %v2195_v3  ;;  %v1067_v24 = vmul.f32 1.442695, %v1048_v15  ;;  %v835_v56 = vand.u32 2147483647, %v2209_v21 }
 0x337   : > { %1738 = vrcp.f32 %v786_v44  ;;  %v1036_v44 = vadd.f32 %v2334_v9, %v2365_v48  ;;  %v849_v53 = vsub.f32 0.0, %v833_v26 }
 0x338   : > { %1740 = vlog2.f32 %v898_v55  ;;  %v851_v16 = vsub.f32 0.0, %v835_v56 }
 0x339   : > { %v1723_v42 = vpop.eup %1722  ;;  %1742 = vlog2.f32 %v889_v28  ;;  %v1071_v28 = vmul.f32 1.442695, %v1050_v52 }
 0x33a   : > { %v920_v1 = vmul.f32 0.6931472, %v1723_v42  ;;  %1744 = vpow2.f32 %v873_v5  ;;  %v1052_v5 = vsub.f32 0.0, %v1036_v44 }
 0x33b   : > { %1746 = vpow2.f32 %v1063_v22  ;;  %v877_v22 = vmul.f32 1.442695, %v849_v53  ;;  %v881_v53 = vmul.f32 1.442695, %v851_v16 }
 0x341   : > { %1249 = vrot.lane.b32.xlu0 %v2209_v21, %s1848_s25 }
 0x345   : > { %1173 = vrot.lane.b32.xlu0 %v1705_v32, %s1848_s25  ;;  %v2349_v32 = vpop.permute.xlu1 %1239 }
 0x350   : > { %1027 = vadd.xlane.f32.xlu1 %v1026_v62  ;;  %v2354_v62 = vpop.permute.xlu1 %1163 }
 0x354   : > { %v1010_v27 = vpop.xlane.xlu1 %1009 }
 0x355   : > { %v1038_v9 = vadd.f32 %v1010_v27, %v2365_v48 }
 0x358   : > { %v2380_v11 = vpop.permute.xlu1 %1243 }
 0x35c   : > { %v2395_v41 = vpop.permute.xlu1 %1167 }
 0x361   : > { %1291 = vrot.lane.b32.xlu1 %v952_v57, %s1848_s25  ;;  %v1725_v57 = vpop.eup %1724 }
 0x362   : > { %v1727_v47 = vpop.eup %1726  ;;  %v900_v33 = vadd.f32 1.0, %v1725_v57 }
 0x363   : > { %v1729_v23 = vpop.eup %1728  ;;  %v891_v39 = vadd.f32 1.0, %v1727_v47  ;;  %v2397_v47 = vpop.permute.xlu0 %1157 }
 0x364   : > { %1024 = vadd.xlane.f32.xlu0 %v1023_v45  ;;  %v1731_v45 = vpop.eup %1730  ;;  %1748 = vlog2.f32 %v900_v33 }
 0x365   : > { %1295 = vrot.lane.b32.xlu1 %v954_v34, %s1848_s25  ;;  %v942_v34 = vadd.f32 %v920_v1, %v718_v7  ;;  %v1733_v42 = vpop.eup %1732  ;;  %v788_v55 = vadd.f32 1.0, %v1731_v45  ;;  %1750 = vlog2.f32 %v891_v39  ;;  %v765_v1 = vmul.f32 1.442695, %v737_v43 }
 0x366   : > { %v924_v57 = vmul.f32 0.6931472, %v1733_v42  ;;  %1752 = vpow2.f32 %v1067_v24  ;;  %v739_v39 = vsub.f32 0.0, %v2209_v21  ;;  %v1075_v43 = vmul.f32 1.442695, %v1052_v5 }
 0x367   : > { %v958_v7 = vadd.f32 1e-06, %v942_v34  ;;  %1754 = vrcp.f32 %v788_v55  ;;  %v2404_v27 = vpop.xlane.xlu0 %1000  ;;  %v1054_v24 = vsub.f32 0.0, %v1038_v9 }
 0x368   : > { %v944_v33 = vadd.f32 %v924_v57, %v720_v31  ;;  %1756 = vpow2.f32 %v765_v1  ;;  %v769_v57 = vmul.f32 1.442695, %v739_v39 }
 0x369   : > { %1299 = vrot.lane.b32.xlu1 %v956_v19, %s1848_s25  ;;  %v1735_v19 = vpop.eup %1734  ;;  %1758 = vpow2.f32 %v1071_v28  ;;  %v1079_v5 = vmul.f32 1.442695, %v1054_v24 }
 0x36a   : > { %v1737_v15 = vpop.eup %1736  ;;  %v893_v45 = vadd.f32 1.0, %v1735_v19  ;;  %1760 = vpow2.f32 %v877_v22  ;;  %v960_v56 = vadd.f32 1e-06, %v944_v33  ;;  %v949_v19 = vadd.f32 1e-06, %v2173_v40 }
 0x36b   : > { %v1739_v26 = vpop.eup %1738  ;;  %v783_v31 = vadd.f32 1.0, %v1737_v15  ;;  %v2411_v15 = vpop.permute.xlu0 %1237 }
 0x36c   : > { %v1741_v34 = vpop.eup %1740  ;;  %1762 = vlog2.f32 %v893_v45  ;;  %v951_v45 = vadd.f32 1e-06, %v2185_v58 }
 0x36d   : > { %1179 = vrot.lane.b32.xlu1 %v1729_v23, %s1848_s25  ;;  %v1016_v23 = vpop.xlane.xlu1 %1015  ;;  %v1743_v42 = vpop.eup %1742  ;;  %v928_v55 = vmul.f32 0.6931472, %v1741_v34  ;;  %1764 = vpow2.f32 %v1075_v43 }
 0x36e   : > { %v1040_v52 = vadd.f32 %v1016_v23, %v2365_v48  ;;  %v1745_v44 = vpop.eup %1744  ;;  %v910_v1 = vmul.f32 0.6931472, %v1743_v42  ;;  %1766 = vpow2.f32 %v881_v53  ;;  %v1029_v42 = vadd.f32 %v2341_v63, %v2365_v48 }
 0x36f   : > { %v1747_v59 = vpop.eup %1746  ;;  %1768 = vrcp.f32 %v783_v31  ;;  %v946_v16 = vadd.f32 %v928_v55, %v722_v49  ;;  %v895_v40 = vadd.f32 1.0, %v1745_v44 }
 0x370   : > { %v1056_v9 = vsub.f32 0.0, %v1040_v52  ;;  %v1094_v23 = vadd.f32 1.0, %v1747_v59  ;;  %1770 = vpow2.f32 %v769_v57  ;;  %v937_v34 = vadd.f32 %v910_v1, %v713_v37  ;;  %v1007_v52 = vpop.xlane.xlu0 %1006 }
 0x371   : > { %1303 = vrot.lane.b32.xlu1 %v958_v7, %s1848_s25  ;;  %v1749_v7 = vpop.eup %1748  ;;  %1772 = vpow2.f32 %v1079_v5  ;;  %v962_v44 = vadd.f32 1e-06, %v946_v16  ;;  %v1045_v31 = vsub.f32 0.0, %v1029_v42 }
 0x372   : > { %v1751_v28 = vpop.eup %1750  ;;  %v1083_v43 = vmul.f32 1.442695, %v1056_v9  ;;  %1774 = vrcp.f32 %v1094_v23  ;;  %v953_v37 = vadd.f32 1e-06, %v937_v34  ;;  %v1035_v34 = vadd.f32 %v2404_v27, %v2365_v48 }
 0x373   : > { %v1753_v22 = vpop.eup %1752  ;;  %v914_v39 = vmul.f32 0.6931472, %v1751_v28  ;;  %1776 = vlog2.f32 %v895_v40  ;;  %v1061_v1 = vmul.f32 1.442695, %v1045_v31  ;;  %v1037_v27 = vadd.f32 %v1007_v52, %v2365_v48 }
 0x374   : > { %v1755_v33 = vpop.eup %1754  ;;  %v1096_v14 = vadd.f32 1.0, %v1753_v22  ;;  %1778 = vpow2.f32 %v1083_v43  ;;  %v2432_v5 = vpop.permute.xlu0 %1241 }
 0x375   : > { %1183 = vrot.lane.b32.xlu1 %v1739_v26, %s1848_s25  ;;  %v932_v26 = vmul.f32 0.6931472, %v1749_v7  ;;  %v1757_v24 = vpop.eup %1756  ;;  %v939_v63 = vadd.f32 %v914_v39, %v715_v61 }
 0x376   : > { %v1759_v49 = vpop.eup %1758  ;;  %v785_v59 = vadd.f32 1.0, %v1757_v24  ;;  %1780 = vrcp.f32 %v1096_v14 }
 0x377   : > { %v948_v4 = vadd.f32 %v932_v26, %v724_v36  ;;  %v1761_v58 = vpop.eup %1760  ;;  %v1098_v55 = vadd.f32 1.0, %v1759_v49 }
 0x378   : > { %v1763_v53 = vpop.eup %1762  ;;  %v897_v7 = vadd.f32 1.0, %v1761_v58  ;;  %1782 = vrcp.f32 %v785_v59  ;;  %v2442_v24 = vpop.permute.xlu0 %1165 }
 0x379   : > { %1307 = vrot.lane.b32.xlu1 %v960_v56, %s1848_s25  ;;  %v1031_v56 = vadd.f32 %v2310_v13, %v2365_v48  ;;  %v1765_v25 = vpop.eup %1764  ;;  %v964_v36 = vadd.f32 1e-06, %v948_v4  ;;  %v918_v20 = vmul.f32 0.6931472, %v1763_v53  ;;  %v1033_v13 = vadd.f32 %v2377_v54, %v2365_v48 }
 0x37a   : > { %1285 = vrot.lane.b32.xlu0 %v949_v19, %s1848_s25  ;;  %v1767_v57 = vpop.eup %1766  ;;  %v955_v19 = vadd.f32 1e-06, %v939_v63  ;;  %1784 = vrcp.f32 %v1098_v55  ;;  %v1100_v23 = vadd.f32 1.0, %v1765_v25 }
 0x37b   : > { %v1769_v61 = vpop.eup %1768  ;;  %v1047_v28 = vsub.f32 0.0, %v1031_v56  ;;  %1786 = vlog2.f32 %v897_v7  ;;  %v899_v16 = vadd.f32 1.0, %v1767_v57  ;;  %v941_v40 = vadd.f32 %v918_v20, %v717_v12 }
 0x37c   : > { %v1771_v9 = vpop.eup %1770  ;;  %1788 = vpow2.f32 %v1061_v1  ;;  %v1049_v54 = vsub.f32 0.0, %v1033_v13  ;;  %v1053_v56 = vsub.f32 0.0, %v1037_v27 }
 0x37d   : > { %1187 = vrot.lane.b32.xlu1 %v1755_v33, %s1848_s25  ;;  %v1773_v22 = vpop.eup %1772  ;;  %1790 = vrcp.f32 %v1100_v23  ;;  %v787_v43 = vadd.f32 1.0, %v1771_v9  ;;  %v957_v12 = vadd.f32 1e-06, %v941_v40 }
 0x37e   : > { %1289 = vrot.lane.b32.xlu0 %v951_v45, %s1848_s25  ;;  %v1775_v26 = vpop.eup %1774  ;;  %v1065_v45 = vmul.f32 1.442695, %v1047_v28  ;;  %v1102_v39 = vadd.f32 1.0, %v1773_v22  ;;  %1792 = vlog2.f32 %v899_v16  ;;  %v1069_v49 = vmul.f32 1.442695, %v1049_v54 }
 0x37f   : > { %v1777_v33 = vpop.eup %1776  ;;  %v1077_v51 = vmul.f32 1.442695, %v1053_v56 }
 0x380   : > { %v1779_v42 = vpop.eup %1778  ;;  %v922_v14 = vmul.f32 0.6931472, %v1777_v33  ;;  %1794 = vpow2.f32 %v1065_v45 }
 0x381   : > { %1311 = vrot.lane.b32.xlu1 %v962_v44, %s1848_s25  ;;  %v1781_v35 = vpop.eup %1780  ;;  %v1051_v44 = vsub.f32 0.0, %v1035_v34  ;;  %1796 = vrcp.f32 %v1102_v39  ;;  %v1104_v4 = vadd.f32 1.0, %v1779_v42 }
 0x382   : > { %1293 = vrot.lane.b32.xlu0 %v953_v37, %s1848_s25  ;;  %v1783_v58 = vpop.eup %1782  ;;  %1798 = vrcp.f32 %v787_v43  ;;  %v1013_v37 = vpop.xlane.xlu0 %1012  ;;  %v943_v53 = vadd.f32 %v922_v14, %v719_v38 }
 0x383   : > { %1800 = vpow2.f32 %v1069_v49  ;;  %v1073_v31 = vmul.f32 1.442695, %v1051_v44  ;;  %v1039_v55 = vadd.f32 %v1013_v37, %v2365_v48  ;;  %v2453_v38 = vpop.permute.xlu1 %1247 }
 0x384   : > { %v1785_v63 = vpop.eup %1784  ;;  %1802 = vrcp.f32 %v1104_v4 }
 0x385   : > { %1315 = vrot.lane.b32.xlu1 %v964_v36, %s1848_s25  ;;  %v1787_v59 = vpop.eup %1786  ;;  %v959_v36 = vadd.f32 1e-06, %v943_v53  ;;  %1804 = vpow2.f32 %v1073_v31 }
 0x386   : > { %1297 = vrot.lane.b32.xlu0 %v955_v19, %s1848_s25  ;;  %v1789_v52 = vpop.eup %1788  ;;  %v926_v7 = vmul.f32 0.6931472, %v1787_v59  ;;  %v1055_v19 = vsub.f32 0.0, %v1039_v55  ;;  %1806 = vpow2.f32 %v1077_v51  ;;  %v2470_v4 = vpop.permute.xlu0 %1245 }
 0x387   : > { %v1791_v25 = vpop.eup %1790  ;;  %v2460_v40 = vpop.permute.xlu1 %1171 }
 0x388   : > { %v1793_v57 = vpop.eup %1792  ;;  %v945_v28 = vadd.f32 %v926_v7, %v721_v60  ;;  %v1081_v23 = vmul.f32 1.442695, %v1055_v19 }
 0x389   : > { %1351 = vrot.lane.b32.xlu1 %v1775_v26, %s1849_s30  ;;  %v930_v13 = vmul.f32 0.6931472, %v1793_v57 }
 0x38a   : > { %1177 = vrot.lane.b32.xlu0 %v1769_v61, %s1848_s25  ;;  %v1795_v20 = vpop.eup %1794  ;;  %v1093_v61 = vadd.f32 1.0, %v1789_v52  ;;  %v961_v33 = vadd.f32 1e-06, %v945_v28  ;;  %v2474_v53 = vpop.permute.xlu0 %1169 }
 0x38b   : > { %v1797_v1 = vpop.eup %1796  ;;  %v1095_v16 = vadd.f32 1.0, %v1795_v20  ;;  %v947_v45 = vadd.f32 %v930_v13, %v723_v46 }
 0x38c   : > { %v1799_v9 = vpop.eup %1798  ;;  %1808 = vrcp.f32 %v1093_v61 }
 0x38d   : > { %1355 = vrot.lane.b32.xlu1 %v1781_v35, %s1849_s30  ;;  %v1801_v22 = vpop.eup %1800  ;;  %1810 = vpow2.f32 %v1081_v23  ;;  %v963_v34 = vadd.f32 1e-06, %v947_v45 }
 0x38e   : > { %1301 = vrot.lane.b32.xlu0 %v957_v12, %s1848_s25  ;;  %v1803_v26 = vpop.eup %1802  ;;  %1812 = vrcp.f32 %v1095_v16  ;;  %v1097_v60 = vadd.f32 1.0, %v1801_v22 }
 0x38f   : > { %v1805_v3 = vpop.eup %1804 }
 0x390   : > { %v1099_v42 = vadd.f32 1.0, %v1805_v3  ;;  %1814 = vrcp.f32 %v1097_v60  ;;  %v1807_v35 = vpop.eup %1806 }
 0x391   : > { %1359 = vrot.lane.b32.xlu1 %v1785_v63, %s1849_s30  ;;  %v1101_v12 = vadd.f32 1.0, %v1807_v35 }
 0x392   : > { %1181 = vrot.lane.b32.xlu0 %v1783_v58, %s1848_s25  ;;  %1816 = vrcp.f32 %v1099_v42 }
 0x395   : > { %1363 = vrot.lane.b32.xlu1 %v1791_v25, %s1849_s30 }
 0x396   : > { %1305 = vrot.lane.b32.xlu0 %v959_v36, %s1848_s25  ;;  %v1809_v21 = vpop.eup %1808 }
 0x397   : > { %v1811_v14 = vpop.eup %1810 }
 0x398   : > { %v1813_v49 = vpop.eup %1812  ;;  %v1103_v44 = vadd.f32 1.0, %v1811_v14 }
 0x399   : > { %1367 = vrot.lane.b32.xlu1 %v1797_v1, %s1849_s30 }
 0x39a   : > { %1185 = vrot.lane.b32.xlu0 %v1799_v9, %s1848_s25  ;;  %v1815_v27 = vpop.eup %1814 }
 0x39c   : > { %v1817_v58 = vpop.eup %1816 }
 0x39d   : > { %1371 = vrot.lane.b32.xlu1 %v1803_v26, %s1849_s30 }
 0x39e   : > { %1309 = vrot.lane.b32.xlu0 %v961_v33, %s1848_s25 }
 0x3a0   : > { %v1022_v54 = vpop.xlane.xlu1 %1021 }
 0x3a1   : > { %v1042_v39 = vadd.f32 %v1022_v54, %v2365_v48 }
 0x3a2   : > { %1313 = vrot.lane.b32.xlu0 %v963_v34, %s1848_s25 }
 0x3a3   : > { %v1058_v43 = vsub.f32 0.0, %v1042_v39 }
 0x3a4   : > { %v1252_v51 = vpop.permute.xlu1 %1251 }
 0x3a5   : > { %v1087_v46 = vmul.f32 1.442695, %v1058_v43 }
 0x3a6   : > { %1349 = vrot.lane.b32.xlu0 %v1809_v21, %s1849_s30 }
 0x3a7   : > { %1818 = vpow2.f32 %v1087_v46 }
 0x3a8   : > { %1820 = vrcp.f32 %v1101_v12  ;;  %v1288_v19 = vpop.permute.xlu1 %1287 }
 0x3a9   : > { %1822 = vrcp.f32 %v1103_v44 }
 0x3aa   : > { %1353 = vrot.lane.b32.xlu0 %v1813_v49, %s1849_s30 }
 0x3ac   : > { %v2481_v61 = vpop.permute.xlu1 %1175 }
 0x3ae   : > { %1357 = vrot.lane.b32.xlu0 %v1815_v27, %s1849_s30 }
 0x3b1   : > { %v1819_v37 = vpop.eup %1818 }
 0x3b2   : > { %v1106_v63 = vadd.f32 1.0, %v1819_v37  ;;  %1361 = vrot.lane.b32.xlu0 %v1817_v58, %s1849_s30  ;;  %v1821_v59 = vpop.eup %1820 }
 0x3b3   : > { %v1823_v56 = vpop.eup %1822 }
 0x3b4   : > { %1824 = vrcp.f32 %v1106_v63 }
 0x3b6   : > { %1365 = vrot.lane.b32.xlu0 %v1821_v59, %s1849_s30 }
 0x3b8   : > { %v1019_v31 = vpop.xlane.xlu0 %1018 }
 0x3b9   : > { %v1041_v55 = vadd.f32 %v1019_v31, %v2365_v48 }
 0x3ba   : > { %1369 = vrot.lane.b32.xlu0 %v1823_v56, %s1849_s30 }
 0x3bb   : > { %v1057_v52 = vsub.f32 0.0, %v1041_v55  ;;  %v1399_v55 = vsel %vm1397_vm3, %v2328_v50, %v2299_v0  ;;  %v1401_v0 = vsel %vm1397_vm3, %v2354_v62, %v2306_v6 }
 0x3bc   : > { %v2484_v16 = vpop.permute.xlu0 %1249 }
 0x3bd   : > { %v1085_v25 = vmul.f32 1.442695, %v1057_v52  ;;  %v1416_v52 = vsel %vm1414_vm4, %v1399_v55, %v1288_v19 }
 0x3be   : > { %v1825_v36 = vpop.eup %1824 }
 0x3bf   : > { %1826 = vpow2.f32 %v1085_v25  ;;  %1375 = vrot.lane.b32.xlu1 %v1825_v36, %s1849_s30 }
 0x3c0   : > { %v2486_v33 = vpop.permute.xlu0 %1173 }
 0x3c9   : > { %v1827_v7 = vpop.eup %1826 }
 0x3ca   : > { %v1105_v57 = vadd.f32 1.0, %v1827_v7 }
 0x3cc   : > { %1828 = vrcp.f32 %v1105_v57 }
 0x3d6   : > { %v1829_v20 = vpop.eup %1828 }
 0x3d7   : > { %1373 = vrot.lane.b32.xlu0 %v1829_v20, %s1849_s30 }
 0x3dd   : > { %v1028_v1 = vpop.xlane.xlu1 %1027 }
 0x3de   : > { %v1044_v28 = vadd.f32 %v1028_v1, %v2365_v48  ;;  %v1403_v1 = vsel %vm1397_vm3, %v2395_v41, %v2315_v18  ;;  %v1407_v41 = vsel %vm1397_vm3, %v2481_v61, %v2349_v32 }
 0x3e0   : > { %v1060_v13 = vsub.f32 0.0, %v1044_v28 }
 0x3e1   : > { %v1292_v9 = vpop.permute.xlu1 %1291 }
 0x3e2   : > { %v1091_v23 = vmul.f32 1.442695, %v1060_v13  ;;  %v1418_v50 = vsel %vm1414_vm4, %v1401_v0, %v1292_v9  ;;  %v1405_v9 = vsel %vm1397_vm3, %v2460_v40, %v2322_v30 }
 0x3e4   : > { %1830 = vpow2.f32 %v1091_v23 }
 0x3e5   : > { %v1296_v22 = vpop.permute.xlu1 %1295 }
 0x3e6   : > { %v1420_v28 = vsel %vm1414_vm4, %v1403_v1, %v1296_v22 }
 0x3e9   : > { %v1300_v26 = vpop.permute.xlu1 %1299 }
 0x3ea   : > { %v1422_v23 = vsel %vm1414_vm4, %v1405_v9, %v1300_v26 }
 0x3ed   : > { %v2488_v45 = vpop.permute.xlu1 %1179 }
 0x3ee   : > { %v1831_v3 = vpop.eup %1830  ;;  %v1409_v40 = vsel %vm1397_vm3, %v2488_v45, %v2380_v11 }
 0x3ef   : > { %v1108_v60 = vadd.f32 1.0, %v1831_v3 }
 0x3f1   : > { %1832 = vrcp.f32 %v1108_v60  ;;  %v1304_v54 = vpop.permute.xlu1 %1303  ;;  %v1025_v34 = vpop.xlane.xlu0 %1024 }
 0x3f2   : > { %v1043_v39 = vadd.f32 %v1025_v34, %v2365_v48  ;;  %v1424_v22 = vsel %vm1414_vm4, %v1407_v41, %v1304_v54 }
 0x3f4   : > { %v1059_v42 = vsub.f32 0.0, %v1043_v39 }
 0x3f5   : > { %v2491_v43 = vpop.permute.xlu1 %1183  ;;  %v2493_v35 = vpop.permute.xlu0 %1285 }
 0x3f6   : > { %v1089_v21 = vmul.f32 1.442695, %v1059_v42 }
 0x3f8   : > { %1834 = vpow2.f32 %v1089_v21 }
 0x3f9   : > { %v1308_v46 = vpop.permute.xlu1 %1307  ;;  %v2495_v12 = vpop.permute.xlu0 %1289 }
 0x3fa   : > { %v1426_v26 = vsel %vm1414_vm4, %v1409_v40, %v1308_v46 }
 0x3fb   : > { %v1833_v14 = vpop.eup %1832 }
 0x3fc   : > { %1379 = vrot.lane.b32.xlu1 %v1833_v14, %s1849_s30  ;;  %v1398_v14 = vsel %vm1397_vm3, %v2397_v47, %v2336_v10  ;;  %v1402_v10 = vsel %vm1397_vm3, %v2442_v24, %v2368_v2  ;;  %v1406_v24 = vsel %vm1397_vm3, %v2486_v33, %v2411_v15 }
 0x3fd   : > { %v1188_v49 = vpop.permute.xlu1 %1187  ;;  %v2498_v44 = vpop.permute.xlu0 %1293  ;;  %v1415_v11 = vsel %vm1414_vm4, %v1398_v14, %v2493_v35 }
 0x3fe   : > { %v1413_v63 = vsel %vm1397_vm3, %v1188_v49, %v1252_v51  ;;  %v1419_v47 = vsel %vm1414_vm4, %v1402_v10, %v2498_v44  ;;  %v1411_v44 = vsel %vm1397_vm3, %v2491_v43, %v2453_v38 }
 0x401   : > { %v2500_v27 = vpop.permute.xlu1 %1311  ;;  %v2502_v48 = vpop.permute.xlu0 %1297 }
 0x402   : > { %v1835_v58 = vpop.eup %1834 }
 0x403   : > { %v1107_v37 = vadd.f32 1.0, %v1835_v58 }
 0x405   : > { %1836 = vrcp.f32 %v1107_v37  ;;  %v1316_v59 = vpop.permute.xlu1 %1315  ;;  %v2505_v31 = vpop.permute.xlu0 %1177 }
 0x406   : > { %v2508_v56 = vsel %vm1414_vm4, %v1413_v63, %v1316_v59  ;;  %v1408_v15 = vsel %vm1397_vm3, %v2505_v31, %v2432_v5 }
 0x409   : > { %v1352_v25 = vpop.permute.xlu1 %1351  ;;  %v1302_v36 = vpop.permute.xlu0 %1301 }
 0x40a   : > { %v1433_v7 = vsel %vm1431_vm5, %v1416_v52, %v1352_v25 }
 0x40b   : > { %1450 = vst.msk [vmem:[%s2518_s7 + $0x8] sm:$0xff] %vm1448_vm6, %v1433_v7 }
 0x40d   : > { %v1356_v57 = vpop.permute.xlu1 %1355  ;;  %v2528_v51 = vpop.permute.xlu0 %1181 }
 0x40e   : > { %v1435_v20 = vsel %vm1431_vm5, %v1418_v50, %v1356_v57 }
 0x40f   : > { %v1837_v19 = vpop.eup %1836  ;;  %1452 = vst.msk [vmem:[%s2518_s7 + $0x18] sm:$0xff] %vm1448_vm6, %v1435_v20 }
 0x410   : > { %1377 = vrot.lane.b32.xlu0 %v1837_v19, %s1849_s30 }
 0x411   : > { %v1360_v6 = vpop.permute.xlu1 %1359  ;;  %v1306_v62 = vpop.permute.xlu0 %1305 }
 0x412   : > { %v1437_v13 = vsel %vm1431_vm5, %v1420_v28, %v1360_v6  ;;  %v1425_v38 = vsel %vm1414_vm4, %v1408_v15, %v1306_v62 }
 0x413   : > { %1454 = vst.msk [vmem:[%s2518_s7 + $0x28] sm:$0xff] %vm1448_vm6, %v1437_v13 }
 0x415   : > { %v1364_v3 = vpop.permute.xlu1 %1363  ;;  %v1186_v60 = vpop.permute.xlu0 %1185 }
 0x416   : > { %v1439_v18 = vsel %vm1431_vm5, %v1422_v23, %v1364_v3  ;;  %v1412_v42 = vsel %vm1397_vm3, %v1186_v60, %v2484_v16  ;;  %v1400_v16 = vsel %vm1397_vm3, %v2345_v8, %v2347_v29  ;;  %v1404_v8 = vsel %vm1397_vm3, %v2474_v53, %v2386_v17 }
 0x417   : > { %1456 = vst.msk [vmem:[%s2518_s7 + $0x38] sm:$0xff] %vm1448_vm6, %v1439_v18  ;;  %v1417_v49 = vsel %vm1414_vm4, %v1400_v16, %v2495_v12  ;;  %v1421_v29 = vsel %vm1414_vm4, %v1404_v8, %v2502_v48  ;;  %v1428_v17 = vsel %vm1414_vm4, %v1411_v44, %v2500_v27  ;;  %v1423_v53 = vsel %vm1414_vm4, %v1406_v24, %v1302_v36 }
 0x418   : > { %v1410_v27 = vsel %vm1397_vm3, %v2528_v51, %v2470_v4 }
 0x419   : > { %v1368_v34 = vpop.permute.xlu1 %1367  ;;  %v1310_v39 = vpop.permute.xlu0 %1309 }
 0x41a   : > { %v1441_v30 = vsel %vm1431_vm5, %v1424_v22, %v1368_v34  ;;  %v1427_v25 = vsel %vm1414_vm4, %v1410_v27, %v1310_v39 }
 0x41b   : > { %1458 = vst.msk [vmem:[%s2518_s7 + $0x48] sm:$0xff] %vm1448_vm6, %v1441_v30 }
 0x41d   : > { %v1372_v32 = vpop.permute.xlu1 %1371  ;;  %v1314_v61 = vpop.permute.xlu0 %1313 }
 0x41e   : > { %v1443_v54 = vsel %vm1431_vm5, %v1426_v26, %v1372_v32  ;;  %v1429_v21 = vsel %vm1414_vm4, %v1412_v42, %v1314_v61 }
 0x41f   : > { %1460 = vst.msk [vmem:[%s2518_s7 + $0x58] sm:$0xff] %vm1448_vm6, %v1443_v54 }
 0x421   : > { %v1350_v45 = vpop.permute.xlu0 %1349 }
 0x422   : > { %v1432_v46 = vsel %vm1431_vm5, %v1415_v11, %v1350_v45 }
 0x423   : > { %1449 = vst.msk [vmem:[%s2518_s7] sm:$0xff] %vm1448_vm6, %v1432_v46 }
 0x425   : > { %v1354_v58 = vpop.permute.xlu0 %1353 }
 0x426   : > { %v1434_v37 = vsel %vm1431_vm5, %v1417_v49, %v1354_v58 }
 0x427   : > { %1451 = vst.msk [vmem:[%s2518_s7 + $0x10] sm:$0xff] %vm1448_vm6, %v1434_v37 }
 0x429   : > { %v1358_v35 = vpop.permute.xlu0 %1357 }
 0x42a   : > { %v1436_v63 = vsel %vm1431_vm5, %v1419_v47, %v1358_v35 }
 0x42b   : > { %1453 = vst.msk [vmem:[%s2518_s7 + $0x20] sm:$0xff] %vm1448_vm6, %v1436_v63 }
 0x42d   : > { %v1362_v12 = vpop.permute.xlu0 %1361 }
 0x42e   : > { %v1438_v2 = vsel %vm1431_vm5, %v1421_v29, %v1362_v12 }
 0x42f   : > { %1455 = vst.msk [vmem:[%s2518_s7 + $0x30] sm:$0xff] %vm1448_vm6, %v1438_v2 }
 0x431   : > { %v1376_v48 = vpop.permute.xlu1 %1375  ;;  %v1366_v59 = vpop.permute.xlu0 %1365 }
 0x432   : > { %v1445_v55 = vsel %vm1431_vm5, %v1428_v17, %v1376_v48  ;;  %v1440_v52 = vsel %vm1431_vm5, %v1423_v53, %v1366_v59 }
 0x433   : > { %1462 = vst.msk [vmem:[%s2518_s7 + $0x68] sm:$0xff] %vm1448_vm6, %v1445_v55  ;;  %1457 = vst.msk [vmem:[%s2518_s7 + $0x40] sm:$0xff] %vm1448_vm6, %v1440_v52 }
 0x435   : > { %v1370_v33 = vpop.permute.xlu0 %1369 }
 0x436   : > { %v1442_v43 = vsel %vm1431_vm5, %v1425_v38, %v1370_v33 }
 0x437   : > { %1459 = vst.msk [vmem:[%s2518_s7 + $0x50] sm:$0xff] %vm1448_vm6, %v1442_v43 }
 0x449   : > { %v1374_v36 = vpop.permute.xlu0 %1373 }
 0x44a   : > { %v1444_v7 = vsel %vm1431_vm5, %v1427_v25, %v1374_v36 }
 0x44b   : > { %1461 = vst.msk [vmem:[%s2518_s7 + $0x60] sm:$0xff] %vm1448_vm6, %v1444_v7 }
 0x46e   : > { %v1380_v0 = vpop.permute.xlu1 %1379 }
 0x46f   : > { %v1447_v5 = vsel %vm1431_vm5, %v2508_v56, %v1380_v0 }
 0x470   : > { %1464 = vst.msk [vmem:[%s2518_s7 + $0x78] sm:$0xff] %vm1448_vm6, %v1447_v5 }
 0x482   : > { %v1378_v31 = vpop.permute.xlu0 %1377 }
 0x483   : > { %v1446_v50 = vsel %vm1431_vm5, %v1429_v21, %v1378_v31 }
 0x484   : > { %1463 = vst.msk [vmem:[%s2518_s7 + $0x70] sm:$0xff] %vm1448_vm6, %v1446_v50 }
 0x485 PF: > { %s14_s15 = sadd.s32 1, %s1844_s15  }
 0x486   : > { %p11_p4 = scmp.ge.s32.totalorder %s14_s15, 4  }
 0x488   :  { %13 = sbr.rel (!%p11_p4) target bundleno = 1 (0x1), region = 66 }

</bundles_post_ra>
